<compile_context>
chip_gen: v6e
topology: v6e:2x2x1
jax: 0.10.0
libtpu: 0.0.40
codegen_flags: <defaults>
</compile_context>

<pallas_src>
import math
import functools

import jax
import jax.numpy as jnp
from jax import lax
from jax.experimental import pallas as pl
from jax.experimental.pallas import tpu as pltpu


def _gelu_exact(x):
    # PyTorch nn.GELU() default = exact erf formulation (pure-VPU polynomial).
    return 0.5 * x * (1.0 + lax.erf(x / jnp.sqrt(jnp.float32(2.0))))


def _gelu_tanh(x):
    # tanh approximation; jnp.tanh lands on the EUP slot (free-ish filler).
    c = jnp.float32(math.sqrt(2.0 / math.pi))
    return 0.5 * x * (1.0 + jnp.tanh(c * (x + jnp.float32(0.044715) * x * x * x)))


def _decoder_kernel(x_ref, w1_ref, b1_ref, w2_ref, b2_ref, wh_ref, bh_ref,
                    out_ref, *, matmul_dtype, approximate_gelu):
    gelu = _gelu_tanh if approximate_gelu else _gelu_exact

    # Shared trunk: Linear -> GELU -> Linear -> GELU.
    # Matmul operands cast to matmul_dtype (bf16 by default), f32 accumulation.
    x = x_ref[...].astype(matmul_dtype)
    h = jnp.dot(x, w1_ref[...], preferred_element_type=jnp.float32) + b1_ref[...]
    h = gelu(h)                                           # f32 VPU math
    h = jnp.dot(h.astype(matmul_dtype), w2_ref[...],
                preferred_element_type=jnp.float32) + b2_ref[...]
    h = gelu(h)

    # Fused heads: [xyz(3) | rotations(6) | scales(3, possibly zero-padded)].
    o = jnp.dot(h.astype(matmul_dtype), wh_ref[...],
                preferred_element_type=jnp.float32) + bh_ref[...]

    # GELU only on the scales columns (indices >= 9).  The 12-wide head sits in
    # a single vreg lane-group, so this select is one lane-group of VPU work.
    col = lax.broadcasted_iota(jnp.int32, o.shape, 1)
    o = jnp.where(col >= 9, gelu(o), o)

    out_ref[...] = o.astype(out_ref.dtype)


def _round_up(x, m):
    return ((x + m - 1) // m) * m


def _choose_block_rows(n, requested, align=16):
    """Row-tile size: multiple of `align` (16 covers bf16 sublane packing),
    no larger than the rounded row count, and -- when N permits -- picked so the
    grid has >= 4 steps and an even step count (v7x has 2 TensorCores)."""
    br = max(align, min(_round_up(requested, align), _round_up(n, align)))
    steps = pl.cdiv(n, br)
    if n >= 4 * align:
        if steps < 4:
            br = max(align, _round_up(pl.cdiv(n, 4), align))
            steps = pl.cdiv(n, br)
        if steps > 1 and steps % 2 == 1:
            br2 = max(align, _round_up(pl.cdiv(n, steps + 1), align))
            if pl.cdiv(n, br2) % 2 == 0:
                br = br2
    return br


def geometry_decoder_pallas(x, params, *, block_rows=4096, use_bf16=True,
                            approximate_gelu=False, return_packed=False):
    """x: [N, n_features] float32.  Returns dict with xyz / rotations / scales
    (or the packed (N, 12) head output if return_packed=True)."""
    n, f = x.shape
    hidden = params["w1"].shape[1]
    n_head = params["wh"].shape[1]          # 12 = 3 + 6 + 3 (scales padded)
    n_scales = int(params.get("n_scales", 3))

    matmul_dtype = jnp.bfloat16 if use_bf16 else jnp.float32
    w1 = params["w1"].astype(matmul_dtype)   # tiny one-time casts (~150 KiB)
    w2 = params["w2"].astype(matmul_dtype)
    wh = params["wh"].astype(matmul_dtype)
    b1 = params["b1"].astype(jnp.float32)
    b2 = params["b2"].astype(jnp.float32)
    bh = params["bh"].astype(jnp.float32)

    br = _choose_block_rows(n, block_rows)
    grid = (pl.cdiv(n, br),)                 # ragged tail handled by Pallas
                                             # edge-block masking (no pad/slice)

    def full(shape):
        return pl.BlockSpec(shape, lambda i: (0,) * len(shape))

    wbytes = jnp.dtype(matmul_dtype).itemsize
    weight_bytes = (wbytes * (f * hidden + hidden * hidden + hidden * n_head)
                    + 4 * (hidden + hidden + n_head))
    cost = pl.CostEstimate(
        flops=2 * n * (f * hidden + hidden * hidden + hidden * n_head),
        transcendentals=n * (2 * hidden + n_head),   # advisory only
        bytes_accessed=n * (f + n_head) * 4 + weight_bytes,
    )

    kernel = functools.partial(_decoder_kernel, matmul_dtype=matmul_dtype,
                               approximate_gelu=approximate_gelu)

    out = pl.pallas_call(
        kernel,
        out_shape=jax.ShapeDtypeStruct((n, n_head), jnp.float32),
        grid_spec=pltpu.PrefetchScalarGridSpec(
            num_scalar_prefetch=0,
            grid=grid,
            in_specs=[
                pl.BlockSpec((br, f), lambda i: (i, 0)),  # x tile
                full((f, hidden)),        # W1
                full((1, hidden)),        # b1
                full((hidden, hidden)),   # W2
                full((1, hidden)),        # b2
                full((hidden, n_head)),   # W heads (concat)
                full((1, n_head)),        # b heads (concat)
            ],
            out_specs=pl.BlockSpec((br, n_head), lambda i: (i, 0)),
        ),
        compiler_params=pltpu.CompilerParams(
            dimension_semantics=("parallel",),
            vmem_limit_bytes=32 * 1024 * 1024),
        cost_estimate=cost,
    )(x, w1, b1, w2, b2, wh, bh)

    if return_packed:
        return out
    return {
        "xyz": out[:, 0:3],
        "rotations": out[:, 3:9],
        "scales": out[:, 9:9 + n_scales],
    }


def geometry_decoder_ref(x, params):
    """Pure-JAX reference mirroring the PyTorch forward (exact GELU, f32)."""
    g = functools.partial(jax.nn.gelu, approximate=False)
    n_scales = int(params.get("n_scales", 3))
    h = g(x @ params["w1"] + params["b1"])
    h = g(h @ params["w2"] + params["b2"])
    o = h @ params["wh"] + params["bh"]
    return {
        "xyz": o[:, 0:3],
        "rotations": o[:, 3:9],
        "scales": g(o[:, 9:9 + n_scales]),
    }


def init_params(key, n_features, hidden_dim, use_surface=False):
    """Deterministic PyTorch-Linear-style init, weights stored (in, out)."""
    n_scales = 2 if use_surface else 3
    ks = jax.random.split(key, 10)

    def linear(kw, kb, fan_in, fan_out):
        bound = 1.0 / math.sqrt(fan_in)
        w = jax.random.uniform(kw, (fan_in, fan_out), jnp.float32, -bound, bound)
        b = jax.random.uniform(kb, (1, fan_out), jnp.float32, -bound, bound)
        return w, b

    w1, b1 = linear(ks[0], ks[1], n_features, hidden_dim)
    w2, b2 = linear(ks[2], ks[3], hidden_dim, hidden_dim)
    wxyz, bxyz = linear(ks[4], ks[5], hidden_dim, 3)
    wrot, brot = linear(ks[6], ks[7], hidden_dim, 6)
    wsc, bsc = linear(ks[8], ks[9], hidden_dim, n_scales)

    # Pad scales head to 3 columns when use_surface=True so the fused head
    # width stays fixed at 12; the wrapper slices back to n_scales columns.
    if n_scales < 3:
        wsc = jnp.pad(wsc, ((0, 0), (0, 3 - n_scales)))
        bsc = jnp.pad(bsc, ((0, 0), (0, 3 - n_scales)))

    return {
        "w1": w1, "b1": b1,
        "w2": w2, "b2": b2,
        "wh": jnp.concatenate([wxyz, wrot, wsc], axis=1),
        "bh": jnp.concatenate([bxyz, brot, bsc], axis=1),
        "n_scales": n_scales,
    }


def _check(out, ref, names, atol, rtol, tag):
    for name in names:
        assert out[name].shape == ref[name].shape, (tag, name, out[name].shape)
        assert jnp.allclose(out[name], ref[name], atol=atol, rtol=rtol), (tag, name)


if __name__ == "__main__":
    key = jax.random.PRNGKey(0)
    k_x, k_p, k_p2 = jax.random.split(key, 3)

    # Small shapes; N deliberately NOT a multiple of the row tile to exercise
    # the masked ragged-tail path (no wrapper-side padding anymore).
    N, n_features, hidden_dim = 1000, 16, 128
    x = jax.random.normal(k_x, (N, n_features), dtype=jnp.float32)
    names = ("xyz", "rotations", "scales")

    # --- use_surface=False (3 scale columns) -------------------------------
    params = init_params(k_p, n_features, hidden_dim, use_surface=False)
    ref = geometry_decoder_ref(x, params)

    # Default fast path: bf16 matmul operands, f32 accumulation.
    out_bf16 = geometry_decoder_pallas(x, params)
    out_bf16 = jax.tree_util.tree_map(jax.block_until_ready, out_bf16)
    _check(out_bf16, ref, names, atol=3e-2, rtol=3e-2, tag="bf16")

    # Exact-f32 parity path behind the flag.
    out_f32 = geometry_decoder_pallas(x, params, use_bf16=False)
    out_f32 = jax.tree_util.tree_map(jax.block_until_ready, out_f32)
    _check(out_f32, ref, names, atol=2e-3, rtol=2e-3, tag="f32")

    # Packed output path (skips the 3 dict column slices).
    packed = geometry_decoder_pallas(x, params, return_packed=True)
    packed = jax.block_until_ready(packed)
    assert packed.shape == (N, 12)

    # --- use_surface=True (2 scale columns) --------------------------------
    params_s = init_params(k_p2, n_features, hidden_dim, use_surface=True)
    ref_s = geometry_decoder_ref(x, params_s)
    out_s = geometry_decoder_pallas(x, params_s)
    out_s = jax.tree_util.tree_map(jax.block_until_ready, out_s)
    assert out_s["scales"].shape == (N, 2)
    _check(out_s, ref_s, names, atol=3e-2, rtol=3e-2, tag="bf16_surface")

    print("KERNEL_OK")
</pallas_src>

<mosaic_0001>
module attributes {stable_mosaic.version = 11 : i64} {
  func.func @_decoder_kernel(%arg0: i32, %arg1: memref<256x16xf32, #tpu.memory_space<vmem>>, %arg2: memref<16x128xbf16, #tpu.memory_space<vmem>>, %arg3: memref<1x128xf32, #tpu.memory_space<vmem>>, %arg4: memref<128x128xbf16, #tpu.memory_space<vmem>>, %arg5: memref<1x128xf32, #tpu.memory_space<vmem>>, %arg6: memref<128x12xbf16, #tpu.memory_space<vmem>>, %arg7: memref<1x12xf32, #tpu.memory_space<vmem>>, %arg8: memref<256x12xf32, #tpu.memory_space<vmem>>) attributes {dimension_semantics = [#tpu.dimension_semantics<parallel>], iteration_bounds = array<i64: 4>, scalar_prefetch = 0 : i64, scratch_operands = 0 : i64, tpu.core_type = #tpu.core_type<tc>, window_params = [{transform_indices = @transform_0, window_bounds = array<i64: 256, 16>}, {pipeline_mode = #tpu.pipeline_mode<synchronous>, transform_indices = @transform_1, window_bounds = array<i64: 16, 128>}, {pipeline_mode = #tpu.pipeline_mode<synchronous>, transform_indices = @transform_2, window_bounds = array<i64: 1, 128>}, {pipeline_mode = #tpu.pipeline_mode<synchronous>, transform_indices = @transform_3, window_bounds = array<i64: 128, 128>}, {pipeline_mode = #tpu.pipeline_mode<synchronous>, transform_indices = @transform_4, window_bounds = array<i64: 1, 128>}, {pipeline_mode = #tpu.pipeline_mode<synchronous>, transform_indices = @transform_5, window_bounds = array<i64: 128, 12>}, {pipeline_mode = #tpu.pipeline_mode<synchronous>, transform_indices = @transform_6, window_bounds = array<i64: 1, 12>}, {transform_indices = @transform_7, window_bounds = array<i64: 256, 12>}]} {
    %c0 = arith.constant 0 : index
    %c0_0 = arith.constant 0 : index
    %0 = vector.load %arg1[%c0, %c0_0] : memref<256x16xf32, #tpu.memory_space<vmem>>, vector<256x16xf32>
    %1 = arith.truncf %0 : vector<256x16xf32> to vector<256x16xbf16>
    %c0_1 = arith.constant 0 : index
    %c0_2 = arith.constant 0 : index
    %2 = vector.load %arg2[%c0_1, %c0_2] : memref<16x128xbf16, #tpu.memory_space<vmem>>, vector<16x128xbf16>
    %cst = arith.constant dense<0.000000e+00> : vector<256x128xf32>
    %3 = tpu.matmul %1, %2, %cst {dimension_numbers = #tpu.dot_dimension_numbers<[1], [0], [0], [1], [0, 0, 1, 1], [], []>} : vector<256x16xbf16>, vector<16x128xbf16>, vector<256x128xf32> -> vector<256x128xf32>
    %c0_3 = arith.constant 0 : index
    %c0_4 = arith.constant 0 : index
    %4 = vector.load %arg3[%c0_3, %c0_4] : memref<1x128xf32, #tpu.memory_space<vmem>>, vector<1x128xf32>
    %5 = vector.broadcast %4 : vector<1x128xf32> to vector<256x128xf32>
    %6 = arith.addf %3, %5 : vector<256x128xf32>
    %cst_5 = arith.constant 5.000000e-01 : f32
    %7 = vector.broadcast %cst_5 : f32 to vector<256x128xf32>
    %8 = arith.mulf %7, %6 : vector<256x128xf32>
    %cst_6 = arith.constant 2.000000e+00 : f32
    %9 = math.sqrt %cst_6 : f32
    %10 = vector.broadcast %9 : f32 to vector<256x128xf32>
    %11 = arith.divf %6, %10 : vector<256x128xf32>
    %12 = math.erf %11 : vector<256x128xf32>
    %cst_7 = arith.constant 1.000000e+00 : f32
    %13 = vector.broadcast %cst_7 : f32 to vector<256x128xf32>
    %14 = arith.addf %13, %12 : vector<256x128xf32>
    %15 = arith.mulf %8, %14 : vector<256x128xf32>
    %16 = arith.truncf %15 : vector<256x128xf32> to vector<256x128xbf16>
    %c0_8 = arith.constant 0 : index
    %c0_9 = arith.constant 0 : index
    %17 = vector.load %arg4[%c0_8, %c0_9] : memref<128x128xbf16, #tpu.memory_space<vmem>>, vector<128x128xbf16>
    %cst_10 = arith.constant dense<0.000000e+00> : vector<256x128xf32>
    %18 = tpu.matmul %16, %17, %cst_10 {dimension_numbers = #tpu.dot_dimension_numbers<[1], [0], [0], [1], [0, 0, 1, 1], [], []>} : vector<256x128xbf16>, vector<128x128xbf16>, vector<256x128xf32> -> vector<256x128xf32>
    %c0_11 = arith.constant 0 : index
    %c0_12 = arith.constant 0 : index
    %19 = vector.load %arg5[%c0_11, %c0_12] : memref<1x128xf32, #tpu.memory_space<vmem>>, vector<1x128xf32>
    %20 = vector.broadcast %19 : vector<1x128xf32> to vector<256x128xf32>
    %21 = arith.addf %18, %20 : vector<256x128xf32>
    %cst_13 = arith.constant 5.000000e-01 : f32
    %22 = vector.broadcast %cst_13 : f32 to vector<256x128xf32>
    %23 = arith.mulf %22, %21 : vector<256x128xf32>
    %cst_14 = arith.constant 2.000000e+00 : f32
    %24 = math.sqrt %cst_14 : f32
    %25 = vector.broadcast %24 : f32 to vector<256x128xf32>
    %26 = arith.divf %21, %25 : vector<256x128xf32>
    %27 = math.erf %26 : vector<256x128xf32>
    %cst_15 = arith.constant 1.000000e+00 : f32
    %28 = vector.broadcast %cst_15 : f32 to vector<256x128xf32>
    %29 = arith.addf %28, %27 : vector<256x128xf32>
    %30 = arith.mulf %23, %29 : vector<256x128xf32>
    %31 = arith.truncf %30 : vector<256x128xf32> to vector<256x128xbf16>
    %c0_16 = arith.constant 0 : index
    %c0_17 = arith.constant 0 : index
    %32 = vector.load %arg6[%c0_16, %c0_17] : memref<128x12xbf16, #tpu.memory_space<vmem>>, vector<128x12xbf16>
    %cst_18 = arith.constant dense<0.000000e+00> : vector<256x12xf32>
    %33 = tpu.matmul %31, %32, %cst_18 {dimension_numbers = #tpu.dot_dimension_numbers<[1], [0], [0], [1], [0, 0, 1, 1], [], []>} : vector<256x128xbf16>, vector<128x12xbf16>, vector<256x12xf32> -> vector<256x12xf32>
    %c0_19 = arith.constant 0 : index
    %c0_20 = arith.constant 0 : index
    %34 = vector.load %arg7[%c0_19, %c0_20] : memref<1x12xf32, #tpu.memory_space<vmem>>, vector<1x12xf32>
    %35 = vector.broadcast %34 : vector<1x12xf32> to vector<256x12xf32>
    %36 = arith.addf %33, %35 : vector<256x12xf32>
    %37 = tpu.iota {dimensions = array<i32: 1>} : vector<256x12xi32>
    %c9_i32 = arith.constant 9 : i32
    %38 = vector.broadcast %c9_i32 : i32 to vector<256x12xi32>
    %39 = arith.cmpi sge, %37, %38 : vector<256x12xi32>
    %cst_21 = arith.constant 5.000000e-01 : f32
    %40 = vector.broadcast %cst_21 : f32 to vector<256x12xf32>
    %41 = arith.mulf %40, %36 : vector<256x12xf32>
    %cst_22 = arith.constant 2.000000e+00 : f32
    %42 = math.sqrt %cst_22 : f32
    %43 = vector.broadcast %42 : f32 to vector<256x12xf32>
    %44 = arith.divf %36, %43 : vector<256x12xf32>
    %45 = math.erf %44 : vector<256x12xf32>
    %cst_23 = arith.constant 1.000000e+00 : f32
    %46 = vector.broadcast %cst_23 : f32 to vector<256x12xf32>
    %47 = arith.addf %46, %45 : vector<256x12xf32>
    %48 = arith.mulf %41, %47 : vector<256x12xf32>
    %49 = arith.select %39, %48, %36 : vector<256x12xi1>, vector<256x12xf32>
    %c0_24 = arith.constant 0 : index
    %c0_25 = arith.constant 0 : index
    %50 = vector.load %arg8[%c0_24, %c0_25] : memref<256x12xf32, #tpu.memory_space<vmem>>, vector<256x12xf32>
    tpu.vector_store %arg8[%c0_24, %c0_25], %49 {strides = array<i32>} : memref<256x12xf32, #tpu.memory_space<vmem>>, vector<256x12xf32>,
    return
  }
  func.func @transform_0(%arg0: i32) -> (i32, i32) {
    %c0_i32 = arith.constant 0 : i32
    %c0_i32_0 = arith.constant 0 : i32
    return %arg0, %c0_i32 : i32, i32
  }
  func.func @transform_1(%arg0: i32) -> (i32, i32) {
    %c0_i32 = arith.constant 0 : i32
    %c0_i32_0 = arith.constant 0 : i32
    %c0_i32_1 = arith.constant 0 : i32
    return %c0_i32, %c0_i32_0 : i32, i32
  }
  func.func @transform_2(%arg0: i32) -> (i32, i32) {
    %c0_i32 = arith.constant 0 : i32
    %c0_i32_0 = arith.constant 0 : i32
    %c0_i32_1 = arith.constant 0 : i32
    return %c0_i32, %c0_i32_0 : i32, i32
  }
  func.func @transform_3(%arg0: i32) -> (i32, i32) {
    %c0_i32 = arith.constant 0 : i32
    %c0_i32_0 = arith.constant 0 : i32
    %c0_i32_1 = arith.constant 0 : i32
    return %c0_i32, %c0_i32_0 : i32, i32
  }
  func.func @transform_4(%arg0: i32) -> (i32, i32) {
    %c0_i32 = arith.constant 0 : i32
    %c0_i32_0 = arith.constant 0 : i32
    %c0_i32_1 = arith.constant 0 : i32
    return %c0_i32, %c0_i32_0 : i32, i32
  }
  func.func @transform_5(%arg0: i32) -> (i32, i32) {
    %c0_i32 = arith.constant 0 : i32
    %c0_i32_0 = arith.constant 0 : i32
    %c0_i32_1 = arith.constant 0 : i32
    return %c0_i32, %c0_i32_0 : i32, i32
  }
  func.func @transform_6(%arg0: i32) -> (i32, i32) {
    %c0_i32 = arith.constant 0 : i32
    %c0_i32_0 = arith.constant 0 : i32
    %c0_i32_1 = arith.constant 0 : i32
    return %c0_i32, %c0_i32_0 : i32, i32
  }
  func.func @transform_7(%arg0: i32) -> (i32, i32) {
    %c0_i32 = arith.constant 0 : i32
    %c0_i32_0 = arith.constant 0 : i32
    return %arg0, %c0_i32 : i32, i32
  }
}

</mosaic_0001>

<bundles_post_ra>
// kernel: tpu_custom_call.1
= control target key start
LH: loop header
LB: loop body
LE: loop exit
PB: predicated region body
PF: predicated region fallthrough
CT: control target
= control target key end

     0   :  { %s2644_s24 = smov 0   ;;  %s2646_s25 = smov 0   ;;  %s3563_s0 = inlined_call_operand.vmem [shape: f32[1000,16], index: 0, kind: input, shape index: {}]   ;;  %s3564_s1 = inlined_call_operand.vmem [shape: bf16[16,128], index: 1, kind: input, shape index: {}]   ;;  %s3565_s2 = inlined_call_operand.vmem [shape: f32[1,128], index: 2, kind: input, shape index: {}]   ;;  %s3566_s3 = inlined_call_operand.vmem [shape: bf16[128,128], index: 3, kind: input, shape index: {}]   ;;  %s3567_s4 = inlined_call_operand.vmem [shape: f32[1,128], index: 4, kind: input, shape index: {}]   ;;  %s3568_s5 = inlined_call_operand.vmem [shape: bf16[128,12], index: 5, kind: input, shape index: {}]   ;;  %s3569_s6 = inlined_call_operand.vmem [shape: f32[1,12], index: 6, kind: input, shape index: {}]   ;;  %s3570_s7 = inlined_call_operand.vmem [shape: f32[1000,12], index: 7, kind: output, shape index: {}]  }
   0x1   :  { %s2648_s26 = smov 0  }
   0x2 LB: > { %s2657_s27 = sadd.s32 4294967295, %s2570_s26   ;;  %s2659_s28 = sadd.s32 1, %s2570_s26   ;;  %s2570_s26 = sphi %s2648_s26, %s3579_s26   ;;  %s2566_s25 = sphi %s2646_s25, %s3578_s25   ;;  %s2562_s24 = sphi %s2644_s24, %s3577_s24  }
   0x3   : > { %s173_s29 = ssub.s32 %s2570_s26, %s2659_s28  ;;  %s176_s30 = sadd.s32 1, %s2566_s25 }
   0x4   : > { %p174_p0 = scmp.eq.s32.totalorder %s173_s29, 0  ;;  %p186_p1 = scmp.ne.s32.totalorder %s2566_s25, %s2562_s24 }
   0x5   : > { %p187_p2 = scmp.eq.s32.totalorder %s2657_s27, 3  ;;  %p1962_p3 = scmp.ge.s32.totalorder %s2570_s26, 1 }
   0x6   : > { %s2667_s8 = scalar_select %p174_p0, %s2566_s25, %s176_s30  }
   0x7   : > { %p2669_p4 = por %p187_p2, %p186_p1  ;;  %p246_p5 = scmp.lt.s32.totalorder %s2570_s26, 5 }
   0x9   : > { %p247_p6 = pnand %p1962_p3, %p246_p5 }
   0xa   : > { %s2677_s12 = sshll.u32 (!%p247_p6), %s2657_s27, 5  ;;  %s278_s26 = sand.u32 (!%p247_p6), 1, %s2562_s24  }
   0xb   : > { %250 = sbr.rel (%p247_p6) target bundleno = 804 (0x324), region = 48  ;;  %p286_p7 = scmp.lt.s32.totalorder (!%p247_p6), %s2677_s12, 124 }
   0xc   : > { %s1963_s29 = sshll.u32 (!%p247_p6), %s278_s26, 8 }
   0xd   : > { %s3151_s24 = scalar_lea.vmem (!%p247_p6), [#allocation2], %s1963_s29  }
  0x10   : > { %v2307_v0 = vld [vmem:[%s3564_s1] sm:$0xff]   ;;  %v2308_v1 = vld [vmem:[%s3566_s3 + $0x38] sm:$0xff]   ;;  %s287_s15 = scalar_select %p286_p7, %s2677_s12, 124  ;;  %vm364_vm0 = vcmask 130048   ;;  %v2309_v50 = vld [vmem:[%s3566_s3 + $0x30] sm:$0xff]   ;;  %vm1586_vm2 = vcmask 97280  }
  0x11   : > { %2087 = vmatprep.subr.bf16.mxu0 %v2307_v0  ;;  %2217 = vmatprep.subr.bf16.mxu1 %v2307_v0  ;;  %v2310_v51 = vld [vmem:[%s3566_s3 + $0x28] sm:$0xff]   ;;  %v2311_v52 = vld [vmem:[%s3566_s3 + $0x20] sm:$0xff]   ;;  %v2312_v53 = vld [vmem:[%s3566_s3 + $0x18] sm:$0xff]   ;;  %s1627_s30 = ssub.s32 (%p2669_p4), 125, %s2677_s12  ;;  %s2019_s10 = sshll.u32 (%p2669_p4), %s2657_s27, 8 }
  0x12   : > { %2088 = vmatpush3.bf16.msra.mxu0 %v2307_v0  ;;  %2218 = vmatpush3.bf16.msra.mxu1 %v2307_v0  ;;  %s1965_s16 = sshll.u32 %s287_s15, 3  ;;  %v2313_v54 = vld [vmem:[%s3566_s3 + $0x10] sm:$0xff]   ;;  %v2314_v55 = vld [vmem:[%s3566_s3 + $0x8] sm:$0xff]   ;;  %v2315_v56 = vld [vmem:[%s3566_s3] sm:$0xff]   ;;  %p1628_p8 = scmp.lt.s32.totalorder (%p2669_p4), %s1627_s30, 32 }
  0x13   : > { %2121 = vmatprep.subr.bf16.mxu1 %v2308_v1  ;;  %s2687_s19 = scalar_lea.vmem %s3563_s0, %s1965_s16  ;;  %v2316_v57 = vld [vmem:[%s3568_s5 + $0x38] sm:$0xff]   ;;  %v2766_v63 = vld [vmem:[%s3565_s2] ss:$0 sm:$0xff]  ;;  %s3431_s14 = scalar_lea.vmem (%p2669_p4), %s3570_s7, %s2019_s10  }
  0x14   : > { %v301_v2 = vld [vmem:[%s2687_s19] sm:$0xff]  ;;  %v302_v3 = vld [vmem:[%s2687_s19 + $0x8] sm:$0xff]  ;;  %v303_v4 = vld [vmem:[%s2687_s19 + $0x10] sm:$0xff]  ;;  %2169 = vmatprep.subr.bf16.mxu0 %v2316_v57 }
  0x15   : > { %v333_v5 = vpack.c.bf16 %v302_v3, %v301_v2  ;;  %v304_v6 = vld [vmem:[%s2687_s19 + $0x18] sm:$0xff]  ;;  %v305_v7 = vld [vmem:[%s2687_s19 + $0x20] sm:$0xff]  ;;  %v306_v8 = vld [vmem:[%s2687_s19 + $0x28] sm:$0xff] }
  0x16   : > { %v334_v9 = vpack.c.bf16 %v304_v6, %v303_v4  ;;  %v335_v10 = vpack.c.bf16 %v306_v8, %v305_v7  ;;  %v317_v11 = vld [vmem:[%s2687_s19 + $0x80] sm:$0xff]  ;;  %v318_v12 = vld [vmem:[%s2687_s19 + $0x88] sm:$0xff]  ;;  %v319_v13 = vld [vmem:[%s2687_s19 + $0x90] sm:$0xff] }
  0x17   : > { %2089 = vmatprep.mubr.msk.bf16.mxu0 %vm364_vm0, %v333_v5  ;;  %v320_v14 = vld [vmem:[%s2687_s19 + $0x98] sm:$0xff]  ;;  %v307_v15 = vld [vmem:[%s2687_s19 + $0x30] sm:$0xff]  ;;  %v341_v16 = vpack.c.bf16 %v318_v12, %v317_v11  ;;  %v321_v19 = vld [vmem:[%s2687_s19 + $0xa0] sm:$0xff] }
  0x18   : > { %2090 = vmatmul.mubr.msk.bf16.vlgmr.msra.gmra.mxu0 %vm364_vm0, %v334_v9  ;;  %v342_v17 = vpack.c.bf16 %v320_v14, %v319_v13  ;;  %v308_v18 = vld [vmem:[%s2687_s19 + $0x38] sm:$0xff]  ;;  %v322_v20 = vld [vmem:[%s2687_s19 + $0xa8] sm:$0xff]  ;;  %v309_v21 = vld [vmem:[%s2687_s19 + $0x40] sm:$0xff] }
  0x19   : > { %2093 = vmatprep.mubr.msk.bf16.mxu0 %vm364_vm0, %v335_v10  ;;  %2105 = vmatprep.mubr.msk.bf16.mxu1 %vm364_vm0, %v341_v16  ;;  %v310_v22 = vld [vmem:[%s2687_s19 + $0x48] sm:$0xff]  ;;  %v343_v23 = vpack.c.bf16 %v322_v20, %v321_v19  ;;  %v336_v24 = vpack.c.bf16 %v308_v18, %v307_v15  ;;  %v323_v25 = vld [vmem:[%s2687_s19 + $0xb0] sm:$0xff]  ;;  %v324_v26 = vld [vmem:[%s2687_s19 + $0xb8] sm:$0xff] }
  0x1a   : > { %2106 = vmatmul.mubr.msk.bf16.vlgmr.msra.gmra.mxu1 %vm364_vm0, %v342_v17  ;;  %v337_v27 = vpack.c.bf16 %v310_v22, %v309_v21  ;;  %v325_v28 = vld [vmem:[%s2687_s19 + $0xc0] sm:$0xff]  ;;  %v326_v29 = vld [vmem:[%s2687_s19 + $0xc8] sm:$0xff]  ;;  %v311_v30 = vld [vmem:[%s2687_s19 + $0x50] sm:$0xff]  ;;  %v344_v32 = vpack.c.bf16 %v324_v26, %v323_v25  ;;  %2170 = vmatpush3.bf16.msra.mxu0 %v2316_v57 }
  0x1b   : > { %2109 = vmatprep.mubr.msk.bf16.mxu1 %vm364_vm0, %v343_v23  ;;  %2122 = vmatpush3.bf16.msra.mxu1 %v2308_v1  ;;  %v312_v31 = vld [vmem:[%s2687_s19 + $0x58] sm:$0xff]  ;;  %v313_v33 = vld [vmem:[%s2687_s19 + $0x60] sm:$0xff]  ;;  %v314_v34 = vld [vmem:[%s2687_s19 + $0x68] sm:$0xff]  ;;  %v345_v35 = vpack.c.bf16 %v326_v29, %v325_v28 }
  0x1c   : > { %v327_v36 = vld [vmem:[%s2687_s19 + $0xd0] sm:$0xff]  ;;  %v338_v37 = vpack.c.bf16 %v312_v31, %v311_v30  ;;  %v328_v38 = vld [vmem:[%s2687_s19 + $0xd8] sm:$0xff]  ;;  %v339_v39 = vpack.c.bf16 %v314_v34, %v313_v33  ;;  %v329_v40 = vld [vmem:[%s2687_s19 + $0xe0] sm:$0xff]  ;;  %2123 = vmatprep.subr.bf16.mxu1 %v2309_v50 }
  0x1d   : > { %v330_v41 = vld [vmem:[%s2687_s19 + $0xe8] sm:$0xff]  ;;  %v346_v42 = vpack.c.bf16 %v328_v38, %v327_v36  ;;  %v315_v44 = vld [vmem:[%s2687_s19 + $0x70] sm:$0xff]  ;;  %v316_v45 = vld [vmem:[%s2687_s19 + $0x78] sm:$0xff] }
  0x1e   : > { %v347_v43 = vpack.c.bf16 %v330_v41, %v329_v40  ;;  %v340_v46 = vpack.c.bf16 %v316_v45, %v315_v44  ;;  %v331_v47 = vld [vmem:[%s2687_s19 + $0xf0] sm:$0xff]  ;;  %v332_v48 = vld [vmem:[%s2687_s19 + $0xf8] sm:$0xff] }
  0x1f   : > { %v348_v49 = vpack.c.bf16 %v332_v48, %v331_v47  ;;  %2124 = vmatpush3.bf16.msra.mxu1 %v2309_v50 }
  0x20   : > { %2094 = vmatmul.mubr.msk.bf16.gmra.mxu0 %vm364_vm0, %v336_v24  ;;  %2125 = vmatprep.subr.bf16.mxu1 %v2310_v51 }
  0x21   : > { %2097 = vmatprep.mubr.msk.bf16.mxu0 %vm364_vm0, %v337_v27 }
  0x22   : > { %2110 = vmatmul.mubr.msk.bf16.gmra.mxu1 %vm364_vm0, %v344_v32 }
  0x23   : > { %2113 = vmatprep.mubr.msk.bf16.mxu1 %vm364_vm0, %v345_v35  ;;  %2126 = vmatpush3.bf16.msra.mxu1 %v2310_v51 }
  0x24   : > { %2127 = vmatprep.subr.bf16.mxu1 %v2311_v52 }
  0x27   : > { %2128 = vmatpush3.bf16.msra.mxu1 %v2311_v52 }
  0x28   : > { %2098 = vmatmul.mubr.msk.bf16.gmra.mxu0 %vm364_vm0, %v338_v37  ;;  %2129 = vmatprep.subr.bf16.mxu1 %v2312_v53 }
  0x29   : > { %2101 = vmatprep.mubr.msk.bf16.mxu0 %vm364_vm0, %v339_v39 }
  0x2a   : > { %2114 = vmatmul.mubr.msk.bf16.gmra.mxu1 %vm364_vm0, %v346_v42 }
  0x2b   : > { %2117 = vmatprep.mubr.msk.bf16.mxu1 %vm364_vm0, %v347_v43  ;;  %2130 = vmatpush3.bf16.msra.mxu1 %v2312_v53 }
  0x2c   : > { %2131 = vmatprep.subr.bf16.mxu1 %v2313_v54 }
  0x2f   : > { %2132 = vmatpush3.bf16.msra.mxu1 %v2313_v54 }
  0x30   : > { %2102 = vmatmul.mubr.msk.bf16.gmra.mxu0 %vm364_vm0, %v340_v46  ;;  %2133 = vmatprep.subr.bf16.mxu1 %v2314_v55 }
  0x32   : > { %2118 = vmatmul.mubr.msk.bf16.gmra.mxu1 %vm364_vm0, %v348_v49 }
  0x33   : > { %2134 = vmatpush3.bf16.msra.mxu1 %v2314_v55 }
  0x34   : > { %2135 = vmatprep.subr.bf16.mxu1 %v2315_v56 }
  0x37   : > { %2136 = vmatpush3.bf16.msra.mxu1 %v2315_v56 }
  0xd8   : > { %v2091_v58 = vpop.f32.mrf.mxu0 }
  0xd9   : > { %v456_v7 = vadd.f32 %v2091_v58, %v2766_v63 }
  0xda   : > { %v447_v59 = vpop.f32.mrf.mxu0  ;;  %v2761_v60 = vpop.f32.mrf.mxu1 }
  0xdb   : > { %v2777_v5 = vadd.f32 %v2766_v63, %v447_v59  ;;  %v609_v14 = vmul.f32 0.70710677, %v456_v7  ;;  %v576_v51 = vmul.f32 0.5, %v456_v7  ;;  %v2841_v55 = vadd.f32 %v2761_v60, %v2766_v63 }
  0xdc   : > { %v2092_v61 = vpop.f32.mrf.mxu0  ;;  %v511_v62 = vpop.f32.mrf.mxu1 }
  0xdd   : > { %v2774_v3 = vadd.f32 %v2092_v61, %v2766_v63  ;;  %v607_v13 = vmul.f32 0.70710677, %v2777_v5  ;;  %v2825_v44 = vadd.f32 %v2766_v63, %v511_v62 }
  0xde   : > { %v450_v0 = vpop.f32.mrf.mxu0  ;;  %v2771_v2 = vpop.f32.mrf.mxu1 }
  0xdf   : > { %v2769_v1 = vadd.f32 %v2766_v63, %v450_v0  ;;  %v610_v11 = vmul.f32 0.70710677, %v2774_v3  ;;  %v577_v59 = vmul.f32 0.5, %v2774_v3  ;;  %v623_v62 = vmul.f32 0.70710677, %v2825_v44 }
  0xe0   : > { %v2095_v4 = vpop.f32.mrf.mxu0  ;;  %v514_v6 = vpop.f32.mrf.mxu1 }
  0xe1   : > { %v608_v9 = vmul.f32 0.70710677, %v2769_v1  ;;  %v2798_v22 = vadd.f32 %v2095_v4, %v2766_v63  ;;  %v2832_v48 = vadd.f32 %v2766_v63, %v514_v6  ;;  %v575_v61 = vmul.f32 0.5, %v2769_v1 }
  0xe2   : > { %v463_v8 = vpop.f32.mrf.mxu0  ;;  %v2781_v10 = vpop.f32.mrf.mxu1 }
  0xe3   : > { %2324 = verf.f32 %v608_v9  ;;  %v2788_v17 = vadd.f32 %v2766_v63, %v463_v8  ;;  %v613_v29 = vmul.f32 0.70710677, %v2798_v22  ;;  %v624_v6 = vmul.f32 0.70710677, %v2832_v48 }
  0xe4   : > { %v2096_v12 = vpop.f32.mrf.mxu0  ;;  %v2785_v16 = vpop.f32.mrf.mxu1  ;;  %2326 = verf.f32 %v610_v11  ;;  %v574_v8 = vmul.f32 0.5, %v2777_v5 }
  0xe5   : > { %v2794_v19 = vadd.f32 %v2096_v12, %v2766_v63  ;;  %2328 = verf.f32 %v607_v13  ;;  %v611_v25 = vmul.f32 0.70710677, %v2788_v17  ;;  %v625_v13 = vmul.f32 0.70710677, %v2841_v55 }
  0xe6   : > { %v466_v15 = vpop.f32.mrf.mxu0  ;;  %2330 = verf.f32 %v609_v14  ;;  %v2800_v24 = vpop.f32.mrf.mxu1  ;;  %v2861_v14 = vadd.f32 %v2771_v2, %v2766_v63 }
  0xe7   : > { %v2791_v18 = vadd.f32 %v2766_v63, %v466_v15  ;;  %v614_v26 = vmul.f32 0.70710677, %v2794_v19 }
  0xe8   : > { %v2099_v20 = vpop.f32.mrf.mxu0  ;;  %v2809_v32 = vpop.f32.mrf.mxu1 }
  0xe9   : > { %v612_v21 = vmul.f32 0.70710677, %v2791_v18  ;;  %v2818_v36 = vadd.f32 %v2099_v20, %v2766_v63  ;;  %v579_v2 = vmul.f32 0.5, %v2791_v18 }
  0xea   : > { %v479_v23 = vpop.f32.mrf.mxu0  ;;  %v2821_v39 = vpop.f32.mrf.mxu1 }
  0xeb   : > { %v2805_v27 = vadd.f32 %v2766_v63, %v479_v23  ;;  %2332 = verf.f32 %v612_v21  ;;  %v617_v47 = vmul.f32 0.70710677, %v2818_v36  ;;  %v578_v21 = vmul.f32 0.5, %v2788_v17 }
  0xec   : > { %v2100_v28 = vpop.f32.mrf.mxu0  ;;  %2334 = verf.f32 %v611_v25  ;;  %v2834_v49 = vpop.f32.mrf.mxu1  ;;  %v2869_v17 = vadd.f32 %v2766_v63, %v2785_v16  ;;  %v580_v16 = vmul.f32 0.5, %v2798_v22 }
  0xed   : > { %v615_v30 = vmul.f32 0.70710677, %v2805_v27  ;;  %2336 = verf.f32 %v614_v26  ;;  %v2812_v33 = vadd.f32 %v2100_v28, %v2766_v63 }
  0xee   : > { %v482_v31 = vpop.f32.mrf.mxu0  ;;  %v2851_v60 = vpop.f32.mrf.mxu1 }
  0xef   : > { %v2815_v34 = vadd.f32 %v2766_v63, %v482_v31  ;;  %2338 = verf.f32 %v615_v30  ;;  %v618_v41 = vmul.f32 0.70710677, %v2812_v33 }
  0xf0   : > { %v2103_v35 = vpop.f32.mrf.mxu0  ;;  %2340 = verf.f32 %v613_v29  ;;  %v2325_v40 = vpop.eup %2324 }
  0xf1   : > { %v616_v37 = vmul.f32 0.70710677, %v2815_v34  ;;  %v2327_v43 = vpop.eup %2326  ;;  %v672_v52 = vadd.f32 1.0, %v2325_v40  ;;  %v2849_v7 = vadd.f32 %v2103_v35, %v2766_v63  ;;  %v546_v29 = vpop.f32.mrf.mxu1 }
  0xf2   : > { %v495_v38 = vpop.f32.mrf.mxu0  ;;  %v2329_v46 = vpop.eup %2328  ;;  %v674_v54 = vadd.f32 1.0, %v2327_v43 }
  0xf3   : > { %2342 = verf.f32 %v616_v37  ;;  %v2828_v45 = vadd.f32 %v2766_v63, %v495_v38  ;;  %v2331_v50 = vpop.eup %2330  ;;  %v671_v58 = vadd.f32 1.0, %v2329_v46  ;;  %v704_v9 = vmul.f32 %v672_v52, %v575_v61 }
  0xf4   : > { %v2104_v42 = vpop.f32.mrf.mxu0  ;;  %2344 = verf.f32 %v618_v41  ;;  %v673_v4 = vadd.f32 1.0, %v2331_v50  ;;  %v706_v12 = vmul.f32 %v674_v54, %v577_v59  ;;  %v621_v26 = vmul.f32 0.70710677, %v2849_v7 }
  0xf5   : > { %v2837_v53 = vadd.f32 %v2104_v42, %v2766_v63  ;;  %v619_v56 = vmul.f32 0.70710677, %v2828_v45  ;;  %2346 = verf.f32 %v617_v47  ;;  %v703_v20 = vmul.f32 %v671_v58, %v574_v8 }
  0xf6   : > { %v498_v57 = vpop.f32.mrf.mxu0  ;;  %v705_v25 = vmul.f32 %v673_v4, %v576_v51  ;;  %v581_v41 = vmul.f32 0.5, %v2794_v19  ;;  %v2874_v46 = vadd.f32 %v2766_v63, %v2809_v32  ;;  %v583_v47 = vmul.f32 0.5, %v2815_v34  ;;  %v2877_v51 = vpop.f32.mrf.mxu1 }
  0xf7   : > { %v622_v11 = vmul.f32 0.70710677, %v2837_v53  ;;  %v2856_v3 = vadd.f32 %v2766_v63, %v498_v57  ;;  %2348 = verf.f32 %v619_v56  ;;  %v735_v35 = vpack.c.bf16 %v704_v9, %v703_v20 }
  0xf8   : > { %v2333_v0 = vpop.eup %2332  ;;  %2350 = verf.f32 %v623_v62  ;;  %v736_v37 = vpack.c.bf16 %v706_v12, %v705_v25  ;;  %v626_v19 = vmul.f32 0.70710677, %v2861_v14  ;;  %v582_v54 = vmul.f32 0.5, %v2805_v27  ;;  %v559_v27 = vpop.f32.mrf.mxu1 }
  0xf9   : > { %v2335_v1 = vpop.eup %2334  ;;  %v676_v5 = vadd.f32 1.0, %v2333_v0  ;;  %2352 = verf.f32 %v624_v6  ;;  %v620_v28 = vmul.f32 0.70710677, %v2856_v3  ;;  %2137 = vmatprep.mubr.bf16.mxu1 %v735_v35  ;;  %v2884_v32 = vadd.f32 %v2781_v10, %v2766_v63 }
  0xfa   : > { %v2337_v15 = vpop.eup %2336  ;;  %v675_v31 = vadd.f32 1.0, %v2335_v1  ;;  %2354 = verf.f32 %v622_v11  ;;  %2138 = vmatmul.mubr.bf16.vlgmr.msra.gmra.mxu1 %v736_v37  ;;  %v627_v57 = vmul.f32 0.70710677, %v2869_v17  ;;  %v2889_v61 = vadd.f32 %v2800_v24, %v2766_v63 }
  0xfb   : > { %v678_v38 = vadd.f32 1.0, %v2337_v15  ;;  %2356 = verf.f32 %v620_v28  ;;  %v708_v42 = vmul.f32 %v676_v5, %v579_v2  ;;  %v628_v22 = vmul.f32 0.70710677, %v2874_v46 }
  0xfc   : > { %v2339_v23 = vpop.eup %2338  ;;  %2358 = verf.f32 %v621_v26  ;;  %v707_v52 = vmul.f32 %v675_v31, %v578_v21  ;;  %v2894_v10 = vadd.f32 %v2766_v63, %v2834_v49  ;;  %v629_v8 = vmul.f32 0.70710677, %v2884_v32  ;;  %v2120_v49 = vpop.f32.mrf.mxu1 }
  0xfd   : > { %v2341_v30 = vpop.eup %2340  ;;  %v679_v43 = vadd.f32 1.0, %v2339_v23  ;;  %v710_v56 = vmul.f32 %v678_v38, %v581_v41  ;;  %2360 = verf.f32 %v625_v13  ;;  %v630_v1 = vmul.f32 0.70710677, %v2889_v61 }
  0xfe   : > { %v677_v18 = vadd.f32 1.0, %v2341_v30  ;;  %v737_v62 = vpack.c.bf16 %v708_v42, %v707_v52  ;;  %2362 = verf.f32 %v626_v19  ;;  %v2899_v12 = vadd.f32 %v2766_v63, %v546_v29 }
  0xff   : > { %v711_v59 = vmul.f32 %v679_v43, %v582_v54  ;;  %2364 = verf.f32 %v627_v57  ;;  %v585_v20 = vmul.f32 0.5, %v2812_v33  ;;  %v631_v5 = vmul.f32 0.70710677, %v2894_v10 }
 0x100   : > { %v2343_v40 = vpop.eup %2342  ;;  %v709_v0 = vmul.f32 %v677_v18, %v580_v16  ;;  %2141 = vmatprep.mubr.bf16.mxu1 %v737_v62  ;;  %2366 = verf.f32 %v628_v22  ;;  %v584_v25 = vmul.f32 0.5, %v2818_v36  ;;  %v590_v29 = vmul.f32 0.5, %v2825_v44  ;;  %v562_v36 = vpop.f32.mrf.mxu1 }
 0x101   : > { %v680_v50 = vadd.f32 1.0, %v2343_v40  ;;  %v2345_v58 = vpop.eup %2344  ;;  %2368 = verf.f32 %v629_v8  ;;  %v2907_v31 = vadd.f32 %v2821_v39, %v2766_v63  ;;  %v632_v33 = vmul.f32 0.70710677, %v2899_v12 }
 0x102   : > { %v2347_v4 = vpop.eup %2346  ;;  %v682_v9 = vadd.f32 1.0, %v2345_v58  ;;  %v738_v24 = vpack.c.bf16 %v710_v56, %v709_v0  ;;  %2370 = verf.f32 %v630_v1  ;;  %v586_v35 = vmul.f32 0.5, %v2828_v45 }
 0x103   : > { %v712_v34 = vmul.f32 %v680_v50, %v583_v47  ;;  %v681_v15 = vadd.f32 1.0, %v2347_v4  ;;  %v587_v37 = vmul.f32 0.5, %v2856_v3  ;;  %v591_v41 = vmul.f32 0.5, %v2832_v48 }
 0x104   : > { %v2349_v11 = vpop.eup %2348  ;;  %2142 = vmatmul.mubr.bf16.gmra.mxu1 %v738_v24  ;;  %v714_v26 = vmul.f32 %v682_v9, %v585_v20  ;;  %2372 = verf.f32 %v631_v5  ;;  %v2915_v44 = vadd.f32 %v2851_v60, %v2766_v63  ;;  %v2918_v39 = vadd.f32 %v2766_v63, %v559_v27 }
 0x105   : > { %v739_v6 = vpack.c.bf16 %v712_v34, %v711_v59  ;;  %v2351_v13 = vpop.eup %2350  ;;  %v683_v28 = vadd.f32 1.0, %v2349_v11  ;;  %v713_v2 = vmul.f32 %v681_v15, %v584_v25  ;;  %2374 = verf.f32 %v632_v33 }
 0x106   : > { %v2353_v21 = vpop.eup %2352  ;;  %v687_v45 = vadd.f32 1.0, %v2351_v13  ;;  %v2921_v3 = vadd.f32 %v2766_v63, %v562_v36  ;;  %v633_v48 = vmul.f32 0.70710677, %v2907_v31  ;;  %v589_v52 = vmul.f32 0.5, %v2837_v53 }
 0x107   : > { %2145 = vmatprep.mubr.bf16.mxu1 %v739_v6  ;;  %v2355_v23 = vpop.eup %2354  ;;  %v715_v42 = vmul.f32 %v683_v28, %v586_v35  ;;  %v740_v47 = vpack.c.bf16 %v714_v26, %v713_v2  ;;  %v688_v50 = vadd.f32 1.0, %v2353_v21  ;;  %v634_v54 = vmul.f32 0.70710677, %v2915_v44 }
 0x108   : > { %v2357_v30 = vpop.eup %2356  ;;  %v686_v43 = vadd.f32 1.0, %v2355_v23  ;;  %v588_v57 = vmul.f32 0.5, %v2849_v7  ;;  %v635_v58 = vmul.f32 0.70710677, %v2918_v39  ;;  %v592_v22 = vmul.f32 0.5, %v2841_v55 }
 0x109   : > { %v684_v38 = vadd.f32 1.0, %v2357_v30  ;;  %v2359_v40 = vpop.eup %2358  ;;  %v719_v62 = vmul.f32 %v687_v45, %v590_v29  ;;  %v720_v0 = vmul.f32 %v688_v50, %v591_v41  ;;  %v636_v27 = vmul.f32 0.70710677, %v2921_v3 }
 0x10a   : > { %v685_v16 = vadd.f32 1.0, %v2359_v40  ;;  %v2361_v19 = vpop.eup %2360  ;;  %v718_v34 = vmul.f32 %v686_v43, %v589_v52  ;;  %v593_v4 = vmul.f32 0.5, %v2861_v14  ;;  %v594_v6 = vmul.f32 0.5, %v2869_v17 }
 0x10b   : > { %v716_v18 = vmul.f32 %v684_v38, %v587_v37  ;;  %v2363_v56 = vpop.eup %2362  ;;  %2376 = verf.f32 %v633_v48  ;;  %v689_v9 = vadd.f32 1.0, %v2361_v19  ;;  %v595_v7 = vmul.f32 0.5, %v2874_v46 }
 0x10c   : > { %2146 = vmatmul.mubr.bf16.gmra.mxu1 %v740_v47  ;;  %v2365_v59 = vpop.eup %2364  ;;  %v717_v8 = vmul.f32 %v685_v16, %v588_v57  ;;  %2378 = verf.f32 %v634_v54  ;;  %v568_v24 = vadd.f32 %v2877_v51, %v2766_v63  ;;  %v690_v11 = vadd.f32 1.0, %v2363_v56 }
 0x10d   : > { %v741_v60 = vpack.c.bf16 %v716_v18, %v715_v42  ;;  %v2367_v53 = vpop.eup %2366  ;;  %2380 = verf.f32 %v635_v58  ;;  %v571_v55 = vadd.f32 %v2120_v49, %v2766_v63  ;;  %v691_v15 = vadd.f32 1.0, %v2365_v59 }
 0x10e   : > { %v742_v1 = vpack.c.bf16 %v718_v34, %v717_v8  ;;  %v2369_v13 = vpop.eup %2368  ;;  %v692_v20 = vadd.f32 1.0, %v2367_v53  ;;  %2382 = verf.f32 %v636_v27  ;;  %v743_v14 = vpack.c.bf16 %v720_v0, %v719_v62  ;;  %v2318_v8 = vld [vmem:[%s3568_s5 + $0x28] sm:$0xff]  }
 0x10f   : > { %2149 = vmatprep.mubr.bf16.mxu1 %v741_v60  ;;  %v2371_v17 = vpop.eup %2370  ;;  %v637_v21 = vmul.f32 0.70710677, %v568_v24  ;;  %v721_v46 = vmul.f32 %v689_v9, %v592_v22  ;;  %v722_v23 = vmul.f32 %v690_v11, %v593_v4  ;;  %v638_v25 = vmul.f32 0.70710677, %v571_v55  ;;  %v2319_v9 = vld [vmem:[%s3568_s5 + $0x20] sm:$0xff]   ;;  %v2322_v11 = vld [vmem:[%s3568_s5 + $0x8] sm:$0xff]  }
 0x110   : > { %v723_v26 = vmul.f32 %v691_v15, %v594_v6  ;;  %v724_v51 = vmul.f32 %v692_v20, %v595_v7  ;;  %v596_v30 = vmul.f32 0.5, %v2884_v32  ;;  %v693_v63 = vadd.f32 1.0, %v2369_v13  ;;  %v2317_v6 = vld [vmem:[%s3568_s5 + $0x30] sm:$0xff]   ;;  %v2320_v7 = vld [vmem:[%s3568_s5 + $0x18] sm:$0xff]  }
 0x111   : > { %v2373_v5 = vpop.eup %2372  ;;  %v597_v49 = vmul.f32 0.5, %v2889_v61  ;;  %2384 = verf.f32 %v637_v21  ;;  %v694_v29 = vadd.f32 1.0, %v2371_v17  ;;  %v598_v33 = vmul.f32 0.5, %v2894_v10  ;;  %2171 = vmatprep.subr.bf16.mxu0 %v2317_v6 }
 0x112   : > { %v2375_v28 = vpop.eup %2374  ;;  %2386 = verf.f32 %v638_v25  ;;  %v744_v2 = vpack.c.bf16 %v722_v23, %v721_v46  ;;  %v695_v35 = vadd.f32 1.0, %v2373_v5  ;;  %v599_v37 = vmul.f32 0.5, %v2899_v12  ;;  %2172 = vmatpush3.bf16.msra.mxu0 %v2317_v6 }
 0x113   : > { %v696_v38 = vadd.f32 1.0, %v2375_v28  ;;  %v745_v36 = vpack.c.bf16 %v724_v51, %v723_v26  ;;  %v725_v42 = vmul.f32 %v693_v63, %v596_v30  ;;  %v726_v32 = vmul.f32 %v694_v29, %v597_v49  ;;  %2173 = vmatprep.subr.bf16.mxu0 %v2318_v8 }
 0x114   : > { %2150 = vmatmul.mubr.bf16.gmra.mxu1 %v742_v1  ;;  %v727_v18 = vmul.f32 %v695_v35, %v598_v33  ;;  %v600_v45 = vmul.f32 0.5, %v2907_v31  ;;  %v601_v10 = vmul.f32 0.5, %v2915_v44  ;;  %v602_v12 = vmul.f32 0.5, %v2918_v39  ;;  %v2968_v1 = vld [vmem:[%s3567_s4] ss:$0 sm:$0xff] }
 0x115   : > { %2153 = vmatprep.mubr.bf16.mxu1 %v743_v14  ;;  %v728_v61 = vmul.f32 %v696_v38, %v599_v37  ;;  %v746_v48 = vpack.c.bf16 %v726_v32, %v725_v42  ;;  %v603_v60 = vmul.f32 0.5, %v2921_v3  ;;  %v604_v22 = vmul.f32 0.5, %v568_v24  ;;  %v2321_v24 = vld [vmem:[%s3568_s5 + $0x10] sm:$0xff]  }
 0x116   : > { %v605_v62 = vmul.f32 0.5, %v571_v55  ;;  %2174 = vmatpush3.bf16.msra.mxu0 %v2318_v8  ;;  %v2323_v55 = vld [vmem:[%s3568_s5] sm:$0xff]  }
 0x117   : > { %v747_v54 = vpack.c.bf16 %v728_v61, %v727_v18  ;;  %2175 = vmatprep.subr.bf16.mxu0 %v2319_v9 }
 0x118   : > { %v2377_v40 = vpop.eup %2376 }
 0x119   : > { %v2379_v41 = vpop.eup %2378  ;;  %v697_v50 = vadd.f32 1.0, %v2377_v40 }
 0x11a   : > { %v2381_v43 = vpop.eup %2380  ;;  %v698_v16 = vadd.f32 1.0, %v2379_v41  ;;  %2176 = vmatpush3.bf16.msra.mxu0 %v2319_v9 }
 0x11b   : > { %v2383_v47 = vpop.eup %2382  ;;  %v699_v52 = vadd.f32 1.0, %v2381_v43  ;;  %v729_v57 = vmul.f32 %v697_v50, %v600_v45  ;;  %2177 = vmatprep.subr.bf16.mxu0 %v2320_v7 }
 0x11c   : > { %2154 = vmatmul.mubr.bf16.gmra.mxu1 %v744_v2  ;;  %v700_v19 = vadd.f32 1.0, %v2383_v47  ;;  %v730_v34 = vmul.f32 %v698_v16, %v601_v10 }
 0x11d   : > { %2157 = vmatprep.mubr.bf16.mxu1 %v745_v36  ;;  %v731_v59 = vmul.f32 %v699_v52, %v602_v12 }
 0x11e   : > { %v2385_v56 = vpop.eup %2384  ;;  %v732_v31 = vmul.f32 %v700_v19, %v603_v60  ;;  %v748_v27 = vpack.c.bf16 %v730_v34, %v729_v57  ;;  %2178 = vmatpush3.bf16.msra.mxu0 %v2320_v7 }
 0x11f   : > { %v2387_v58 = vpop.eup %2386  ;;  %v701_v44 = vadd.f32 1.0, %v2385_v56  ;;  %2179 = vmatprep.subr.bf16.mxu0 %v2321_v24 }
 0x120   : > { %v702_v0 = vadd.f32 1.0, %v2387_v58  ;;  %v749_v39 = vpack.c.bf16 %v732_v31, %v731_v59 }
 0x121   : > { %v733_v53 = vmul.f32 %v701_v44, %v604_v22 }
 0x122   : > { %v734_v3 = vmul.f32 %v702_v0, %v605_v62  ;;  %2180 = vmatpush3.bf16.msra.mxu0 %v2321_v24 }
 0x123   : > { %2181 = vmatprep.subr.bf16.mxu0 %v2322_v11 }
 0x124   : > { %2158 = vmatmul.mubr.bf16.gmra.mxu1 %v746_v48  ;;  %v750_v4 = vpack.c.bf16 %v734_v3, %v733_v53 }
 0x125   : > { %2161 = vmatprep.mubr.bf16.mxu1 %v747_v54 }
 0x126   : > { %2182 = vmatpush3.bf16.msra.mxu0 %v2322_v11 }
 0x127   : > { %2183 = vmatprep.subr.bf16.mxu0 %v2323_v55 }
 0x12a   : > { %2184 = vmatpush3.bf16.msra.mxu0 %v2323_v55 }
 0x12c   : > { %2162 = vmatmul.mubr.bf16.gmra.mxu1 %v748_v27 }
 0x12d   : > { %2165 = vmatprep.mubr.bf16.mxu1 %v749_v39 }
 0x134   : > { %2166 = vmatmul.mubr.bf16.gmra.mxu1 %v750_v4 }
 0x1ba   : > { %v2139_v13 = vpop.f32.mrf.mxu1 }
 0x1bb   : > { %v865_v15 = vadd.f32 %v2139_v13, %v2968_v1 }
 0x1bc   : > { %v856_v20 = vpop.f32.mrf.mxu1 }
 0x1bd   : > { %v857_v14 = vadd.f32 %v2968_v1, %v856_v20  ;;  %v1017_v17 = vmul.f32 0.70710677, %v865_v15  ;;  %v985_v44 = vmul.f32 0.5, %v865_v15 }
 0x1be   : > { %v2140_v21 = vpop.f32.mrf.mxu1 }
 0x1bf   : > { %v1015_v5 = vmul.f32 0.70710677, %v857_v14  ;;  %v868_v46 = vadd.f32 %v2140_v21, %v2968_v1  ;;  %v983_v16 = vmul.f32 0.5, %v857_v14 }
 0x1c0   : > { %v859_v23 = vpop.f32.mrf.mxu1 }
 0x1c1   : > { %2388 = verf.f32 %v1015_v5  ;;  %v1018_v25 = vmul.f32 0.70710677, %v868_v46  ;;  %v860_v26 = vadd.f32 %v2968_v1, %v859_v23  ;;  %v986_v57 = vmul.f32 0.5, %v868_v46 }
 0x1c2   : > { %2390 = verf.f32 %v1017_v17 }
 0x1c3   : > { %2392 = verf.f32 %v1018_v25  ;;  %v1016_v28 = vmul.f32 0.70710677, %v860_v26  ;;  %v984_v59 = vmul.f32 0.5, %v860_v26 }
 0x1c4   : > { %v2143_v51 = vpop.f32.mrf.mxu1 }
 0x1c5   : > { %v2975_v30 = vadd.f32 %v2143_v51, %v2968_v1  ;;  %2394 = verf.f32 %v1016_v28 }
 0x1c6   : > { %v872_v63 = vpop.f32.mrf.mxu1 }
 0x1c7   : > { %v873_v49 = vadd.f32 %v2968_v1, %v872_v63  ;;  %v1021_v29 = vmul.f32 0.70710677, %v2975_v30 }
 0x1c8   : > { %v2144_v33 = vpop.f32.mrf.mxu1 }
 0x1c9   : > { %v1019_v2 = vmul.f32 0.70710677, %v873_v49  ;;  %v884_v35 = vadd.f32 %v2144_v33, %v2968_v1  ;;  %v987_v15 = vmul.f32 0.5, %v873_v49 }
 0x1ca   : > { %v875_v37 = vpop.f32.mrf.mxu1 }
 0x1cb   : > { %2396 = verf.f32 %v1019_v2  ;;  %v1022_v38 = vmul.f32 0.70710677, %v884_v35  ;;  %v2981_v36 = vadd.f32 %v2968_v1, %v875_v37  ;;  %v990_v25 = vmul.f32 0.5, %v884_v35 }
 0x1cc   : > { %2398 = verf.f32 %v1021_v29  ;;  %v2147_v40 = vpop.f32.mrf.mxu1  ;;  %v989_v29 = vmul.f32 0.5, %v2975_v30 }
 0x1cd   : > { %2400 = verf.f32 %v1022_v38  ;;  %v1020_v41 = vmul.f32 0.70710677, %v2981_v36  ;;  %v2985_v42 = vadd.f32 %v2147_v40, %v2968_v1  ;;  %v988_v28 = vmul.f32 0.5, %v2981_v36 }
 0x1ce   : > { %v888_v32 = vpop.f32.mrf.mxu1  ;;  %v2389_v18 = vpop.eup %2388 }
 0x1cf   : > { %2402 = verf.f32 %v1020_v41  ;;  %v1025_v43 = vmul.f32 0.70710677, %v2985_v42  ;;  %v2989_v61 = vadd.f32 %v2968_v1, %v888_v32  ;;  %v2391_v45 = vpop.eup %2390  ;;  %v1079_v52 = vadd.f32 1.0, %v2389_v18 }
 0x1d0   : > { %v2148_v47 = vpop.f32.mrf.mxu1  ;;  %v2393_v50 = vpop.eup %2392  ;;  %v1081_v56 = vadd.f32 1.0, %v2391_v45 }
 0x1d1   : > { %v2992_v10 = vadd.f32 %v2148_v47, %v2968_v1  ;;  %v1023_v12 = vmul.f32 0.70710677, %v2989_v61  ;;  %v1082_v60 = vadd.f32 1.0, %v2393_v50  ;;  %2404 = verf.f32 %v1025_v43 }
 0x1d2   : > { %v891_v48 = vpop.f32.mrf.mxu1  ;;  %v2395_v54 = vpop.eup %2394  ;;  %v1111_v39 = vmul.f32 %v1079_v52, %v983_v16  ;;  %v1113_v4 = vmul.f32 %v1081_v56, %v985_v44 }
 0x1d3   : > { %v1026_v19 = vmul.f32 0.70710677, %v2992_v10  ;;  %2406 = verf.f32 %v1023_v12  ;;  %v2997_v34 = vadd.f32 %v2968_v1, %v891_v48  ;;  %v1080_v31 = vadd.f32 1.0, %v2395_v54 }
 0x1d4   : > { %v2151_v58 = vpop.f32.mrf.mxu1  ;;  %v1114_v62 = vmul.f32 %v1082_v60, %v986_v57 }
 0x1d5   : > { %2408 = verf.f32 %v1026_v19  ;;  %v3000_v22 = vadd.f32 %v2151_v58, %v2968_v1  ;;  %v1024_v0 = vmul.f32 0.70710677, %v2997_v34  ;;  %v1112_v53 = vmul.f32 %v1080_v31, %v984_v59 }
 0x1d6   : > { %v904_v27 = vpop.f32.mrf.mxu1  ;;  %v1144_v13 = vpack.c.bf16 %v1114_v62, %v1113_v4  ;;  %v994_v58 = vmul.f32 0.5, %v2992_v10  ;;  %v991_v31 = vmul.f32 0.5, %v2989_v61  ;;  %v992_v44 = vmul.f32 0.5, %v2997_v34 }
 0x1d7   : > { %2410 = verf.f32 %v1024_v0  ;;  %v1029_v6 = vmul.f32 0.70710677, %v3000_v22  ;;  %v3005_v8 = vadd.f32 %v2968_v1, %v904_v27  ;;  %v1143_v11 = vpack.c.bf16 %v1112_v53, %v1111_v39 }
 0x1d8   : > { %v2397_v3 = vpop.eup %2396  ;;  %v2152_v9 = vpop.f32.mrf.mxu1  ;;  %v993_v39 = vmul.f32 0.5, %v2985_v42 }
 0x1d9   : > { %v2399_v7 = vpop.eup %2398  ;;  %v3008_v24 = vadd.f32 %v2152_v9, %v2968_v1  ;;  %v1027_v20 = vmul.f32 0.70710677, %v3005_v8  ;;  %v1083_v17 = vadd.f32 1.0, %v2397_v3  ;;  %2412 = verf.f32 %v1029_v6  ;;  %2185 = vmatprep.mubr.bf16.mxu0 %v1143_v11 }
 0x1da   : > { %v2401_v55 = vpop.eup %2400  ;;  %v907_v14 = vpop.f32.mrf.mxu1  ;;  %v1085_v23 = vadd.f32 1.0, %v2399_v7  ;;  %2186 = vmatmul.mubr.bf16.vlgmr.msra.gmra.mxu0 %v1144_v13 }
 0x1db   : > { %v1086_v21 = vadd.f32 1.0, %v2401_v55  ;;  %v1030_v5 = vmul.f32 0.70710677, %v3008_v24  ;;  %2414 = verf.f32 %v1027_v20  ;;  %v3013_v26 = vadd.f32 %v2968_v1, %v907_v14 }
 0x1dc   : > { %v2403_v46 = vpop.eup %2402  ;;  %v2155_v51 = vpop.f32.mrf.mxu1  ;;  %v1115_v35 = vmul.f32 %v1083_v17, %v987_v15  ;;  %v1117_v32 = vmul.f32 %v1085_v23, %v989_v29 }
 0x1dd   : > { %v1084_v63 = vadd.f32 1.0, %v2403_v46  ;;  %2416 = verf.f32 %v1030_v5  ;;  %v3017_v49 = vadd.f32 %v2155_v51, %v2968_v1  ;;  %v1118_v33 = vmul.f32 %v1086_v21, %v990_v25 }
 0x1de   : > { %v1028_v2 = vmul.f32 0.70710677, %v3013_v26  ;;  %v920_v37 = vpop.f32.mrf.mxu1  ;;  %v2405_v41 = vpop.eup %2404  ;;  %v998_v51 = vmul.f32 0.5, %v3008_v24  ;;  %v996_v29 = vmul.f32 0.5, %v3013_v26 }
 0x1df   : > { %v1116_v38 = vmul.f32 %v1084_v63, %v988_v28  ;;  %v1033_v40 = vmul.f32 0.70710677, %v3017_v49  ;;  %v3023_v36 = vadd.f32 %v2968_v1, %v920_v37  ;;  %v1146_v12 = vpack.c.bf16 %v1118_v33, %v1117_v32 }
 0x1e0   : > { %2418 = verf.f32 %v1028_v2  ;;  %v2156_v43 = vpop.f32.mrf.mxu1  ;;  %v2407_v18 = vpop.eup %2406  ;;  %v1089_v57 = vadd.f32 1.0, %v2405_v41  ;;  %v995_v63 = vmul.f32 0.5, %v3005_v8 }
 0x1e1   : > { %v3026_v47 = vadd.f32 %v2156_v43, %v2968_v1  ;;  %v1145_v30 = vpack.c.bf16 %v1116_v38, %v1115_v35  ;;  %v1031_v50 = vmul.f32 0.70710677, %v3023_v36  ;;  %2420 = verf.f32 %v1033_v40 }
 0x1e2   : > { %v2409_v45 = vpop.eup %2408  ;;  %v923_v16 = vpop.f32.mrf.mxu1  ;;  %v1087_v19 = vadd.f32 1.0, %v2407_v18  ;;  %v1121_v34 = vmul.f32 %v1089_v57, %v993_v39  ;;  %v997_v35 = vmul.f32 0.5, %v3000_v22  ;;  %v999_v39 = vmul.f32 0.5, %v3023_v36 }
 0x1e3   : > { %v1090_v48 = vadd.f32 1.0, %v2409_v45  ;;  %v1034_v52 = vmul.f32 0.70710677, %v3026_v47  ;;  %v3031_v60 = vadd.f32 %v2968_v1, %v923_v16  ;;  %2189 = vmatprep.mubr.bf16.mxu0 %v1145_v30  ;;  %2422 = verf.f32 %v1031_v50 }
 0x1e4   : > { %v2159_v54 = vpop.f32.mrf.mxu1  ;;  %2190 = vmatmul.mubr.bf16.gmra.mxu0 %v1146_v12  ;;  %v2411_v56 = vpop.eup %2410  ;;  %v1119_v4 = vmul.f32 %v1087_v19, %v991_v31 }
 0x1e5   : > { %2424 = verf.f32 %v1034_v52  ;;  %v1032_v59 = vmul.f32 0.70710677, %v3031_v60  ;;  %v1088_v62 = vadd.f32 1.0, %v2411_v56  ;;  %v3038_v0 = vadd.f32 %v2159_v54, %v2968_v1 }
 0x1e6   : > { %v936_v27 = vpop.f32.mrf.mxu1  ;;  %v1122_v53 = vmul.f32 %v1090_v48, %v994_v58  ;;  %v2413_v10 = vpop.eup %2412  ;;  %v1002_v56 = vmul.f32 0.5, %v3026_v47  ;;  %v1000_v57 = vmul.f32 0.5, %v3031_v60 }
 0x1e7   : > { %2426 = verf.f32 %v1032_v59  ;;  %v3042_v3 = vadd.f32 %v2968_v1, %v936_v27  ;;  %v1120_v6 = vmul.f32 %v1088_v62, %v992_v44  ;;  %v1037_v9 = vmul.f32 0.70710677, %v3038_v0 }
 0x1e8   : > { %v2160_v61 = vpop.f32.mrf.mxu1  ;;  %v2415_v7 = vpop.eup %2414  ;;  %v1148_v17 = vpack.c.bf16 %v1122_v53, %v1121_v34  ;;  %v1093_v25 = vadd.f32 1.0, %v2413_v10  ;;  %v1001_v27 = vmul.f32 0.5, %v3017_v49 }
 0x1e9   : > { %v1035_v11 = vmul.f32 0.70710677, %v3042_v3  ;;  %v3047_v55 = vadd.f32 %v2160_v61, %v2968_v1  ;;  %v1147_v15 = vpack.c.bf16 %v1120_v6, %v1119_v4  ;;  %2428 = verf.f32 %v1037_v9 }
 0x1ea   : > { %v2417_v13 = vpop.eup %2416  ;;  %v939_v42 = vpop.f32.mrf.mxu1  ;;  %v1091_v21 = vadd.f32 1.0, %v2415_v7  ;;  %v1125_v30 = vmul.f32 %v1093_v25, %v997_v35 }
 0x1eb   : > { %v1094_v20 = vadd.f32 1.0, %v2417_v13  ;;  %v1038_v14 = vmul.f32 0.70710677, %v3047_v55  ;;  %2430 = verf.f32 %v1035_v11  ;;  %v3051_v5 = vadd.f32 %v2968_v1, %v939_v42  ;;  %2193 = vmatprep.mubr.bf16.mxu0 %v1147_v15 }
 0x1ec   : > { %v2163_v46 = vpop.f32.mrf.mxu1  ;;  %2194 = vmatmul.mubr.bf16.gmra.mxu0 %v1148_v17  ;;  %v1123_v41 = vmul.f32 %v1091_v21, %v995_v63  ;;  %v1006_v63 = vmul.f32 0.5, %v3047_v55 }
 0x1ed   : > { %v2419_v23 = vpop.eup %2418  ;;  %2432 = verf.f32 %v1038_v14  ;;  %v3055_v28 = vadd.f32 %v2163_v46, %v2968_v1  ;;  %v1036_v2 = vmul.f32 0.70710677, %v3051_v5  ;;  %v1126_v38 = vmul.f32 %v1094_v20, %v998_v51 }
 0x1ee   : > { %v1092_v33 = vadd.f32 1.0, %v2419_v23  ;;  %v952_v37 = vpop.f32.mrf.mxu1  ;;  %v2421_v24 = vpop.eup %2420  ;;  %v1003_v51 = vmul.f32 0.5, %v3042_v3 }
 0x1ef   : > { %v3062_v40 = vadd.f32 %v2968_v1, %v952_v37  ;;  %2434 = verf.f32 %v1036_v2  ;;  %v1041_v8 = vmul.f32 0.70710677, %v3055_v28  ;;  %v1150_v52 = vpack.c.bf16 %v1126_v38, %v1125_v30 }
 0x1f0   : > { %v1124_v32 = vmul.f32 %v1092_v33, %v996_v29  ;;  %v2164_v43 = vpop.f32.mrf.mxu1  ;;  %v2423_v18 = vpop.eup %2422  ;;  %v1097_v31 = vadd.f32 1.0, %v2421_v24  ;;  %v1004_v29 = vmul.f32 0.5, %v3051_v5  ;;  %v1005_v37 = vmul.f32 0.5, %v3038_v0 }
 0x1f1   : > { %v1039_v26 = vmul.f32 0.70710677, %v3062_v40  ;;  %v3067_v50 = vadd.f32 %v2164_v43, %v2968_v1  ;;  %v1095_v54 = vadd.f32 1.0, %v2423_v18 }
 0x1f2   : > { %v2425_v45 = vpop.eup %2424  ;;  %v955_v22 = vpop.f32.mrf.mxu1  ;;  %v1149_v16 = vpack.c.bf16 %v1124_v32, %v1123_v41  ;;  %v1129_v34 = vmul.f32 %v1097_v31, %v1001_v27 }
 0x1f3   : > { %v1098_v12 = vadd.f32 1.0, %v2425_v45  ;;  %2436 = verf.f32 %v1039_v26  ;;  %v3070_v48 = vadd.f32 %v2968_v1, %v955_v22  ;;  %v1042_v58 = vmul.f32 0.70710677, %v3067_v50 }
 0x1f4   : > { %v2427_v19 = vpop.eup %2426  ;;  %2197 = vmatprep.mubr.bf16.mxu0 %v1149_v16  ;;  %v2167_v59 = vpop.f32.mrf.mxu1  ;;  %2438 = verf.f32 %v1041_v8  ;;  %v1127_v9 = vmul.f32 %v1095_v54, %v999_v39  ;;  %v1007_v8 = vmul.f32 0.5, %v3062_v40  ;;  %v1010_v45 = vmul.f32 0.5, %v3067_v50 }
 0x1f5   : > { %v1096_v44 = vadd.f32 1.0, %v2427_v19  ;;  %v1040_v62 = vmul.f32 0.70710677, %v3070_v48  ;;  %2198 = vmatmul.mubr.bf16.gmra.mxu0 %v1150_v52  ;;  %2440 = verf.f32 %v1042_v58  ;;  %v3079_v53 = vadd.f32 %v2167_v59, %v2968_v1 }
 0x1f6   : > { %v968_v47 = vpop.f32.mrf.mxu1  ;;  %v1130_v60 = vmul.f32 %v1098_v12, %v1002_v56  ;;  %v2429_v6 = vpop.eup %2428  ;;  %v1008_v0 = vmul.f32 0.5, %v3070_v48  ;;  %v1009_v16 = vmul.f32 0.5, %v3055_v28 }
 0x1f7   : > { %v1128_v10 = vmul.f32 %v1096_v44, %v1000_v57  ;;  %2442 = verf.f32 %v1040_v62  ;;  %v3082_v4 = vadd.f32 %v2968_v1, %v968_v47  ;;  %v1045_v49 = vmul.f32 0.70710677, %v3079_v53 }
 0x1f8   : > { %v2168_v61 = vpop.f32.mrf.mxu1  ;;  %v2431_v7 = vpop.eup %2430  ;;  %v1152_v14 = vpack.c.bf16 %v1130_v60, %v1129_v34  ;;  %v1101_v25 = vadd.f32 1.0, %v2429_v6  ;;  %v1013_v47 = vmul.f32 0.5, %v3079_v53  ;;  %v3101_v34 = vld [vmem:[%s3569_s6] ss:$0 sm:$0xff] }
 0x1f9   : > { %v1043_v36 = vmul.f32 0.70710677, %v3082_v4  ;;  %v980_v11 = vadd.f32 %v2168_v61, %v2968_v1  ;;  %v1151_v15 = vpack.c.bf16 %v1128_v10, %v1127_v9  ;;  %v1099_v17 = vadd.f32 1.0, %v2431_v7 }
 0x1fa   : > { %v2433_v13 = vpop.eup %2432  ;;  %v971_v42 = vpop.f32.mrf.mxu1  ;;  %v1133_v41 = vmul.f32 %v1101_v25, %v1005_v37  ;;  %v1011_v48 = vmul.f32 0.5, %v3082_v4 }
 0x1fb   : > { %v1102_v20 = vadd.f32 1.0, %v2433_v13  ;;  %2444 = verf.f32 %v1043_v36  ;;  %v1046_v21 = vmul.f32 0.70710677, %v980_v11  ;;  %v972_v46 = vadd.f32 %v2968_v1, %v971_v42  ;;  %2201 = vmatprep.mubr.bf16.mxu0 %v1151_v15 }
 0x1fc   : > { %v2435_v23 = vpop.eup %2434  ;;  %2446 = verf.f32 %v1045_v49  ;;  %v1131_v24 = vmul.f32 %v1099_v17, %v1003_v51  ;;  %v1014_v27 = vmul.f32 0.5, %v980_v11 }
 0x1fd   : > { %2202 = vmatmul.mubr.bf16.gmra.mxu0 %v1152_v14  ;;  %v1100_v33 = vadd.f32 1.0, %v2435_v23  ;;  %2448 = verf.f32 %v1046_v21  ;;  %v1044_v2 = vmul.f32 0.70710677, %v972_v46  ;;  %v1134_v35 = vmul.f32 %v1102_v20, %v1006_v63 }
 0x1fe   : > { %v1012_v39 = vmul.f32 0.5, %v972_v46 }
 0x1ff   : > { %v1132_v1 = vmul.f32 %v1100_v33, %v1004_v29  ;;  %2450 = verf.f32 %v1044_v2  ;;  %v1154_v55 = vpack.c.bf16 %v1134_v35, %v1133_v41  ;;  %v1391_v29 = vlaneseq }
 0x200   : > { %v2437_v38 = vpop.eup %2436 }
 0x201   : > { %v2439_v32 = vpop.eup %2438  ;;  %v1153_v43 = vpack.c.bf16 %v1132_v1, %v1131_v24  ;;  %v1103_v18 = vadd.f32 1.0, %v2437_v38  ;;  %v3132_v1 = vand.u32 127, %v1391_v29 }
 0x202   : > { %v2441_v3 = vpop.eup %2440  ;;  %v1105_v26 = vadd.f32 1.0, %v2439_v32 }
 0x203   : > { %v1106_v5 = vadd.f32 1.0, %v2441_v3  ;;  %2205 = vmatprep.mubr.bf16.mxu0 %v1153_v43  ;;  %v1135_v12 = vmul.f32 %v1103_v18, %v1007_v8  ;;  %vm1393_vm1 = vcmp.ge.s32.totalorder %v3132_v1, 9 }
 0x204   : > { %v2443_v30 = vpop.eup %2442  ;;  %v1137_v56 = vmul.f32 %v1105_v26, %v1009_v16 }
 0x205   : > { %v1104_v22 = vadd.f32 1.0, %v2443_v30  ;;  %2206 = vmatmul.mubr.bf16.gmra.mxu0 %v1154_v55  ;;  %v1138_v52 = vmul.f32 %v1106_v5, %v1010_v45 }
 0x207   : > { %v1136_v19 = vmul.f32 %v1104_v22, %v1008_v0  ;;  %v1156_v40 = vpack.c.bf16 %v1138_v52, %v1137_v56 }
 0x208   : > { %v2445_v54 = vpop.eup %2444 }
 0x209   : > { %v1155_v57 = vpack.c.bf16 %v1136_v19, %v1135_v12  ;;  %v2447_v58 = vpop.eup %2446  ;;  %v1107_v31 = vadd.f32 1.0, %v2445_v54 }
 0x20a   : > { %v2449_v59 = vpop.eup %2448  ;;  %v1109_v50 = vadd.f32 1.0, %v2447_v58 }
 0x20b   : > { %2209 = vmatprep.mubr.bf16.mxu0 %v1155_v57  ;;  %v1110_v44 = vadd.f32 1.0, %v2449_v59  ;;  %v1139_v10 = vmul.f32 %v1107_v31, %v1011_v48 }
 0x20c   : > { %v2451_v62 = vpop.eup %2450  ;;  %v1141_v9 = vmul.f32 %v1109_v50, %v1013_v47 }
 0x20d   : > { %2210 = vmatmul.mubr.bf16.gmra.mxu0 %v1156_v40  ;;  %v1108_v28 = vadd.f32 1.0, %v2451_v62  ;;  %v1142_v60 = vmul.f32 %v1110_v44, %v1014_v27 }
 0x20f   : > { %v1140_v6 = vmul.f32 %v1108_v28, %v1012_v39  ;;  %v1158_v7 = vpack.c.bf16 %v1142_v60, %v1141_v9 }
 0x211   : > { %v1157_v61 = vpack.c.bf16 %v1140_v6, %v1139_v10 }
 0x213   : > { %2213 = vmatprep.mubr.bf16.mxu0 %v1157_v61 }
 0x215   : > { %2214 = vmatmul.mubr.bf16.gmra.mxu0 %v1158_v7 }
 0x29a   : > { %v2187_v49 = vpop.f32.mrf.mxu0 }
 0x29b   : > { %v1273_v4 = vadd.f32 %v2187_v49, %v3101_v34 }
 0x29c   : > { %v1264_v36 = vpop.f32.mrf.mxu0 }
 0x29d   : > { %v1428_v11 = vmul.f32 0.70710677, %v1273_v4  ;;  %v3105_v53 = vadd.f32 %v3101_v34, %v1264_v36  ;;  %v1396_v18 = vmul.f32 0.5, %v1273_v4 }
 0x29e   : > { %v2188_v13 = vpop.f32.mrf.mxu0 }
 0x29f   : > { %2452 = verf.f32 %v1428_v11  ;;  %v1426_v42 = vmul.f32 0.70710677, %v3105_v53  ;;  %v3109_v15 = vadd.f32 %v2188_v13, %v3101_v34  ;;  %v1394_v0 = vmul.f32 0.5, %v3105_v53 }
 0x2a0   : > { %v1267_v20 = vpop.f32.mrf.mxu0 }
 0x2a1   : > { %2454 = verf.f32 %v1426_v42  ;;  %v1429_v14 = vmul.f32 0.70710677, %v3109_v15  ;;  %v3113_v17 = vadd.f32 %v3101_v34, %v1267_v20  ;;  %v1397_v57 = vmul.f32 0.5, %v3109_v15 }
 0x2a3   : > { %2456 = verf.f32 %v1429_v14  ;;  %v1427_v46 = vmul.f32 0.70710677, %v3113_v17  ;;  %v1395_v27 = vmul.f32 0.5, %v3113_v17 }
 0x2a4   : > { %v2191_v21 = vpop.f32.mrf.mxu0 }
 0x2a5   : > { %v3117_v23 = vadd.f32 %v2191_v21, %v3101_v34  ;;  %2458 = verf.f32 %v1427_v46 }
 0x2a6   : > { %v1280_v25 = vpop.f32.mrf.mxu0 }
 0x2a7   : > { %v1432_v51 = vmul.f32 0.70710677, %v3117_v23  ;;  %v3121_v63 = vadd.f32 %v3101_v34, %v1280_v25  ;;  %v1400_v9 = vmul.f32 0.5, %v3117_v23 }
 0x2a8   : > { %v2192_v33 = vpop.f32.mrf.mxu0 }
 0x2a9   : > { %2460 = verf.f32 %v1432_v51  ;;  %v1430_v2 = vmul.f32 0.70710677, %v3121_v63  ;;  %v3125_v37 = vadd.f32 %v2192_v33, %v3101_v34  ;;  %v1398_v13 = vmul.f32 0.5, %v3121_v63 }
 0x2aa   : > { %v1283_v35 = vpop.f32.mrf.mxu0 }
 0x2ab   : > { %2462 = verf.f32 %v1430_v2  ;;  %v1433_v38 = vmul.f32 0.70710677, %v3125_v37  ;;  %v3130_v24 = vadd.f32 %v3101_v34, %v1283_v35  ;;  %v1401_v25 = vmul.f32 0.5, %v3125_v37 }
 0x2ac   : > { %v2195_v32 = vpop.f32.mrf.mxu0  ;;  %v2453_v43 = vpop.eup %2452 }
 0x2ad   : > { %2464 = verf.f32 %v1433_v38  ;;  %v1431_v41 = vmul.f32 0.70710677, %v3130_v24  ;;  %v3136_v3 = vadd.f32 %v2195_v32, %v3101_v34  ;;  %v1492_v55 = vadd.f32 1.0, %v2453_v43 }
 0x2ae   : > { %v1296_v30 = vpop.f32.mrf.mxu0  ;;  %v2455_v8 = vpop.eup %2454 }
 0x2af   : > { %2466 = verf.f32 %v1431_v41  ;;  %v1436_v5 = vmul.f32 0.70710677, %v3136_v3  ;;  %v3141_v26 = vadd.f32 %v3101_v34, %v1296_v30  ;;  %v1524_v45 = vmul.f32 %v1492_v55, %v1396_v18 }
 0x2b0   : > { %v1490_v22 = vadd.f32 1.0, %v2455_v8  ;;  %v2196_v16 = vpop.f32.mrf.mxu0  ;;  %v2457_v12 = vpop.eup %2456  ;;  %v1399_v41 = vmul.f32 0.5, %v3130_v24 }
 0x2b1   : > { %2468 = verf.f32 %v1436_v5  ;;  %v1434_v52 = vmul.f32 0.70710677, %v3141_v26  ;;  %v3146_v19 = vadd.f32 %v2196_v16, %v3101_v34  ;;  %v1556_v54 = vsel %vm1393_vm1, %v1524_v45, %v1273_v4 }
 0x2b2   : > { %v1522_v56 = vmul.f32 %v1490_v22, %v1394_v0  ;;  %v1493_v58 = vadd.f32 1.0, %v2457_v12  ;;  %v1299_v59 = vpop.f32.mrf.mxu0  ;;  %v2459_v40 = vpop.eup %2458  ;;  %1589 = vst.msk [vmem:[%s3151_s24 + $0x10] sm:$0xff] %vm1586_vm2, %v1556_v54  ;;  %v1404_v45 = vmul.f32 0.5, %v3136_v3 }
 0x2b3   : > { %2470 = verf.f32 %v1434_v52  ;;  %v1437_v31 = vmul.f32 0.70710677, %v3146_v19  ;;  %v3157_v44 = vadd.f32 %v3101_v34, %v1299_v59  ;;  %v1491_v48 = vadd.f32 1.0, %v2459_v40 }
 0x2b4   : > { %v1554_v62 = vsel %vm1393_vm1, %v1522_v56, %v3105_v53  ;;  %v1525_v50 = vmul.f32 %v1493_v58, %v1397_v57  ;;  %v1402_v52 = vmul.f32 0.5, %v3141_v26 }
 0x2b5   : > { %v2199_v39 = vpop.f32.mrf.mxu0  ;;  %1587 = vst.msk [vmem:[%s3151_s24] sm:$0xff] %vm1586_vm2, %v1554_v62  ;;  %2472 = verf.f32 %v1437_v31  ;;  %v1435_v47 = vmul.f32 0.70710677, %v3157_v44  ;;  %v1523_v6 = vmul.f32 %v1491_v48, %v1395_v27 }
 0x2b6   : > { %v2461_v28 = vpop.eup %2460  ;;  %v3167_v60 = vadd.f32 %v2199_v39, %v3101_v34  ;;  %v1557_v10 = vsel %vm1393_vm1, %v1525_v50, %v3109_v15  ;;  %v1405_v50 = vmul.f32 0.5, %v3146_v19  ;;  %v1403_v39 = vmul.f32 0.5, %v3157_v44 }
 0x2b7   : > { %v1496_v61 = vadd.f32 1.0, %v2461_v28  ;;  %v1312_v7 = vpop.f32.mrf.mxu0  ;;  %1590 = vst.msk [vmem:[%s3151_s24 + $0x18] sm:$0xff] %vm1586_vm2, %v1557_v10  ;;  %2474 = verf.f32 %v1435_v47  ;;  %v1555_v11 = vsel %vm1393_vm1, %v1523_v6, %v3113_v17 }
 0x2b8   : > { %v2463_v49 = vpop.eup %2462  ;;  %v1440_v4 = vmul.f32 0.70710677, %v3167_v60  ;;  %v3177_v36 = vadd.f32 %v3101_v34, %v1312_v7  ;;  %1588 = vst.msk [vmem:[%s3151_s24 + $0x8] sm:$0xff] %vm1586_vm2, %v1555_v11 }
 0x2b9   : > { %v1528_v53 = vmul.f32 %v1496_v61, %v1400_v9  ;;  %v1494_v42 = vadd.f32 1.0, %v2463_v49  ;;  %v2200_v15 = vpop.f32.mrf.mxu0 }
 0x2ba   : > { %v2465_v20 = vpop.eup %2464  ;;  %2476 = verf.f32 %v1440_v4  ;;  %v1438_v14 = vmul.f32 0.70710677, %v3177_v36  ;;  %v3187_v21 = vadd.f32 %v2200_v15, %v3101_v34  ;;  %v1406_v15 = vmul.f32 0.5, %v3177_v36 }
 0x2bb   : > { %v1560_v17 = vsel %vm1393_vm1, %v1528_v53, %v3117_v23  ;;  %v1526_v46 = vmul.f32 %v1494_v42, %v1398_v13  ;;  %v1497_v51 = vadd.f32 1.0, %v2465_v20  ;;  %v1315_v29 = vpop.f32.mrf.mxu0 }
 0x2bc   : > { %v2467_v33 = vpop.eup %2466  ;;  %1593 = vst.msk [vmem:[%s3151_s24 + $0x30] sm:$0xff] %vm1586_vm2, %v1560_v17  ;;  %2478 = verf.f32 %v1438_v14  ;;  %v1441_v2 = vmul.f32 0.70710677, %v3187_v21  ;;  %v3197_v35 = vadd.f32 %v3101_v34, %v1315_v29 }
 0x2bd   : > { %v1558_v38 = vsel %vm1393_vm1, %v1526_v46, %v3121_v63  ;;  %v1529_v23 = vmul.f32 %v1497_v51, %v1401_v25  ;;  %v1495_v32 = vadd.f32 1.0, %v2467_v33  ;;  %v2203_v43 = vpop.f32.mrf.mxu0 }
 0x2be   : > { %1591 = vst.msk [vmem:[%s3151_s24 + $0x20] sm:$0xff] %vm1586_vm2, %v1558_v38  ;;  %2480 = verf.f32 %v1441_v2  ;;  %v1439_v18 = vmul.f32 0.70710677, %v3197_v35  ;;  %v3207_v55 = vadd.f32 %v2203_v43, %v3101_v34  ;;  %v2469_v30 = vpop.eup %2468  ;;  %v1407_v43 = vmul.f32 0.5, %v3197_v35 }
 0x2bf   : > { %v1561_v8 = vsel %vm1393_vm1, %v1529_v23, %v3125_v37  ;;  %v1527_v63 = vmul.f32 %v1495_v32, %v1399_v41  ;;  %v1328_v5 = vpop.f32.mrf.mxu0  ;;  %v1500_v0 = vadd.f32 1.0, %v2469_v30 }
 0x2c0   : > { %1594 = vst.msk [vmem:[%s3151_s24 + $0x38] sm:$0xff] %vm1586_vm2, %v1561_v8  ;;  %2482 = verf.f32 %v1439_v18  ;;  %v1444_v22 = vmul.f32 0.70710677, %v3207_v55  ;;  %v2471_v16 = vpop.eup %2470  ;;  %v3221_v37 = vadd.f32 %v3101_v34, %v1328_v5 }
 0x2c1   : > { %v1559_v12 = vsel %vm1393_vm1, %v1527_v63, %v3130_v24  ;;  %v2204_v54 = vpop.f32.mrf.mxu0  ;;  %v1532_v56 = vmul.f32 %v1500_v0, %v1404_v45  ;;  %v1498_v57 = vadd.f32 1.0, %v2471_v16 }
 0x2c2   : > { %1592 = vst.msk [vmem:[%s3151_s24 + $0x28] sm:$0xff] %vm1586_vm2, %v1559_v12  ;;  %2484 = verf.f32 %v1444_v22  ;;  %v3226_v58 = vadd.f32 %v2204_v54, %v3101_v34  ;;  %v2473_v59 = vpop.eup %2472  ;;  %v1442_v40 = vmul.f32 0.70710677, %v3221_v37 }
 0x2c3   : > { %v1331_v31 = vpop.f32.mrf.mxu0  ;;  %v1564_v24 = vsel %vm1393_vm1, %v1532_v56, %v3136_v3  ;;  %v1530_v62 = vmul.f32 %v1498_v57, %v1402_v52  ;;  %v1501_v27 = vadd.f32 1.0, %v2473_v59 }
 0x2c4   : > { %v2475_v48 = vpop.eup %2474  ;;  %1597 = vst.msk [vmem:[%s3151_s24 + $0x50] sm:$0xff] %vm1586_vm2, %v1564_v24  ;;  %2486 = verf.f32 %v1442_v40  ;;  %v1445_v28 = vmul.f32 0.70710677, %v3226_v58  ;;  %v3238_v47 = vadd.f32 %v3101_v34, %v1331_v31 }
 0x2c5   : > { %v2207_v10 = vpop.f32.mrf.mxu0  ;;  %v1562_v3 = vsel %vm1393_vm1, %v1530_v62, %v3141_v26  ;;  %v1533_v6 = vmul.f32 %v1501_v27, %v1405_v50  ;;  %v1499_v9 = vadd.f32 1.0, %v2475_v48  ;;  %v1408_v26 = vmul.f32 0.5, %v3167_v60 }
 0x2c6   : > { %v3244_v61 = vadd.f32 %v2207_v10, %v3101_v34  ;;  %1595 = vst.msk [vmem:[%s3151_s24 + $0x40] sm:$0xff] %vm1586_vm2, %v1562_v3  ;;  %2488 = verf.f32 %v1445_v28  ;;  %v1443_v49 = vmul.f32 0.70710677, %v3238_v47  ;;  %v1410_v62 = vmul.f32 0.5, %v3221_v37 }
 0x2c7   : > { %v2477_v7 = vpop.eup %2476  ;;  %v1344_v4 = vpop.f32.mrf.mxu0  ;;  %v1565_v11 = vsel %vm1393_vm1, %v1533_v6, %v3146_v19  ;;  %v1531_v53 = vmul.f32 %v1499_v9, %v1403_v39  ;;  %v1413_v6 = vmul.f32 0.5, %v3226_v58 }
 0x2c8   : > { %v1504_v13 = vadd.f32 1.0, %v2477_v7  ;;  %1598 = vst.msk [vmem:[%s3151_s24 + $0x58] sm:$0xff] %vm1586_vm2, %v1565_v11  ;;  %2490 = verf.f32 %v1443_v49  ;;  %v1448_v20 = vmul.f32 0.70710677, %v3244_v61  ;;  %v3258_v14 = vadd.f32 %v3101_v34, %v1344_v4 }
 0x2c9   : > { %v2479_v42 = vpop.eup %2478  ;;  %v2208_v17 = vpop.f32.mrf.mxu0  ;;  %v1563_v19 = vsel %vm1393_vm1, %v1531_v53, %v3157_v44  ;;  %v1409_v44 = vmul.f32 0.5, %v3187_v21 }
 0x2ca   : > { %v1536_v46 = vmul.f32 %v1504_v13, %v1408_v26  ;;  %v1502_v25 = vadd.f32 1.0, %v2479_v42  ;;  %v3264_v51 = vadd.f32 %v2208_v17, %v3101_v34  ;;  %1596 = vst.msk [vmem:[%s3151_s24 + $0x48] sm:$0xff] %vm1586_vm2, %v1563_v19  ;;  %2492 = verf.f32 %v1448_v20 }
 0x2cb   : > { %v2481_v29 = vpop.eup %2480  ;;  %v1446_v33 = vmul.f32 0.70710677, %v3258_v14  ;;  %v1347_v2 = vpop.f32.mrf.mxu0  ;;  %v1411_v26 = vmul.f32 0.5, %v3238_v47 }
 0x2cc   : > { %v1568_v38 = vsel %vm1393_vm1, %v1536_v46, %v3167_v60  ;;  %v1534_v23 = vmul.f32 %v1502_v25, %v1406_v15  ;;  %v1505_v41 = vadd.f32 1.0, %v2481_v29  ;;  %v1449_v18 = vmul.f32 0.70710677, %v3264_v51 }
 0x2cd   : > { %v2483_v32 = vpop.eup %2482  ;;  %1601 = vst.msk [vmem:[%s3151_s24 + $0x70] sm:$0xff] %vm1586_vm2, %v1568_v38  ;;  %2494 = verf.f32 %v1446_v33  ;;  %v3278_v30 = vadd.f32 %v3101_v34, %v1347_v2  ;;  %v2211_v8 = vpop.f32.mrf.mxu0  ;;  %v1416_v46 = vmul.f32 0.5, %v3244_v61 }
 0x2ce   : > { %v1566_v60 = vsel %vm1393_vm1, %v1534_v23, %v3177_v36  ;;  %v1537_v63 = vmul.f32 %v1505_v41, %v1409_v44  ;;  %v1503_v5 = vadd.f32 1.0, %v2483_v32  ;;  %v3284_v45 = vadd.f32 %v2211_v8, %v3101_v34 }
 0x2cf   : > { %v2485_v0 = vpop.eup %2484  ;;  %1599 = vst.msk [vmem:[%s3151_s24 + $0x60] sm:$0xff] %vm1586_vm2, %v1566_v60  ;;  %2496 = verf.f32 %v1449_v18  ;;  %v1447_v22 = vmul.f32 0.70710677, %v3278_v30  ;;  %v1360_v16 = vpop.f32.mrf.mxu0  ;;  %v1412_v36 = vmul.f32 0.5, %v3207_v55  ;;  %v1414_v44 = vmul.f32 0.5, %v3258_v14 }
 0x2d0   : > { %v1569_v12 = vsel %vm1393_vm1, %v1537_v63, %v3187_v21  ;;  %v1535_v52 = vmul.f32 %v1503_v5, %v1407_v43  ;;  %v1508_v54 = vadd.f32 1.0, %v2485_v0  ;;  %v1452_v56 = vmul.f32 0.70710677, %v3284_v45 }
 0x2d1   : > { %1602 = vst.msk [vmem:[%s3151_s24 + $0x78] sm:$0xff] %vm1586_vm2, %v1569_v12  ;;  %2498 = verf.f32 %v1447_v22  ;;  %v3297_v57 = vadd.f32 %v3101_v34, %v1360_v16  ;;  %v2212_v59 = vpop.f32.mrf.mxu0  ;;  %v2487_v40 = vpop.eup %2486  ;;  %v1417_v63 = vmul.f32 0.5, %v3264_v51  ;;  %v1415_v12 = vmul.f32 0.5, %v3278_v30 }
 0x2d2   : > { %v1567_v31 = vsel %vm1393_vm1, %v1535_v52, %v3197_v35  ;;  %v1540_v21 = vmul.f32 %v1508_v54, %v1412_v36  ;;  %v3303_v24 = vadd.f32 %v2212_v59, %v3101_v34  ;;  %v1506_v50 = vadd.f32 1.0, %v2487_v40 }
 0x2d3   : > { %1600 = vst.msk [vmem:[%s3151_s24 + $0x68] sm:$0xff] %vm1586_vm2, %v1567_v31  ;;  %2500 = verf.f32 %v1452_v56  ;;  %v1450_v27 = vmul.f32 0.70710677, %v3297_v57  ;;  %v1363_v48 = vpop.f32.mrf.mxu0  ;;  %v2489_v39 = vpop.eup %2488  ;;  %v1420_v56 = vmul.f32 0.5, %v3284_v45 }
 0x2d4   : > { %v1572_v28 = vsel %vm1393_vm1, %v1540_v21, %v3207_v55  ;;  %v1453_v35 = vmul.f32 0.70710677, %v3303_v24  ;;  %v3314_v10 = vadd.f32 %v3101_v34, %v1363_v48  ;;  %v1538_v3 = vmul.f32 %v1506_v50, %v1410_v62 }
 0x2d5   : > { %1605 = vst.msk [vmem:[%s3151_s24 + $0x90] sm:$0xff] %vm1586_vm2, %v1572_v28  ;;  %v1509_v9 = vadd.f32 1.0, %v2489_v39  ;;  %2502 = verf.f32 %v1450_v27  ;;  %v2215_v7 = vpop.f32.mrf.mxu0  ;;  %v2491_v49 = vpop.eup %2490  ;;  %v1418_v62 = vmul.f32 0.5, %v3297_v57 }
 0x2d6   : > { %2504 = verf.f32 %v1453_v35  ;;  %v1451_v4 = vmul.f32 0.70710677, %v3314_v10  ;;  %v3321_v55 = vadd.f32 %v2215_v7, %v3101_v34  ;;  %v1570_v11 = vsel %vm1393_vm1, %v1538_v3, %v3221_v37 }
 0x2d7   : > { %v1541_v53 = vmul.f32 %v1509_v9, %v1413_v6  ;;  %v1507_v13 = vadd.f32 1.0, %v2491_v49  ;;  %v1376_v42 = vpop.f32.mrf.mxu0  ;;  %v2493_v15 = vpop.eup %2492  ;;  %1603 = vst.msk [vmem:[%s3151_s24 + $0x80] sm:$0xff] %vm1586_vm2, %v1570_v11  ;;  %v1419_v35 = vmul.f32 0.5, %v3314_v10 }
 0x2d8   : > { %2506 = verf.f32 %v1451_v4  ;;  %v1456_v20 = vmul.f32 0.70710677, %v3321_v55  ;;  %v3331_v17 = vadd.f32 %v3101_v34, %v1376_v42  ;;  %v1512_v25 = vadd.f32 1.0, %v2493_v15 }
 0x2d9   : > { %v1573_v19 = vsel %vm1393_vm1, %v1541_v53, %v3226_v58  ;;  %v1539_v37 = vmul.f32 %v1507_v13, %v1411_v26  ;;  %v2216_v29 = vpop.f32.mrf.mxu0  ;;  %v1424_v49 = vmul.f32 0.5, %v3321_v55 }
 0x2da   : > { %v2495_v33 = vpop.eup %2494  ;;  %1606 = vst.msk [vmem:[%s3151_s24 + $0x98] sm:$0xff] %vm1586_vm2, %v1573_v19  ;;  %2508 = verf.f32 %v1456_v20  ;;  %v1454_v2 = vmul.f32 0.70710677, %v3331_v17  ;;  %v3341_v38 = vadd.f32 %v2216_v29, %v3101_v34  ;;  %v1544_v23 = vmul.f32 %v1512_v25, %v1416_v46 }
 0x2db   : > { %v1571_v58 = vsel %vm1393_vm1, %v1539_v37, %v3238_v47  ;;  %v1510_v41 = vadd.f32 1.0, %v2495_v33  ;;  %v1379_v32 = vpop.f32.mrf.mxu0  ;;  %v1422_v26 = vmul.f32 0.5, %v3331_v17 }
 0x2dc   : > { %v2497_v43 = vpop.eup %2496  ;;  %1604 = vst.msk [vmem:[%s3151_s24 + $0x88] sm:$0xff] %vm1586_vm2, %v1571_v58  ;;  %2510 = verf.f32 %v1454_v2  ;;  %v1457_v18 = vmul.f32 0.70710677, %v3341_v38  ;;  %v3351_v8 = vadd.f32 %v3101_v34, %v1379_v32  ;;  %v1576_v60 = vsel %vm1393_vm1, %v1544_v23, %v3244_v61 }
 0x2dd   : > { %v1542_v47 = vmul.f32 %v1510_v41, %v1414_v44  ;;  %v1513_v5 = vadd.f32 1.0, %v2497_v43  ;;  %1609 = vst.msk [vmem:[%s3151_s24 + $0xb0] sm:$0xff] %vm1586_vm2, %v1576_v60  ;;  %v1425_v20 = vmul.f32 0.5, %v3341_v38 }
 0x2de   : > { %v2499_v0 = vpop.eup %2498  ;;  %2512 = verf.f32 %v1457_v18  ;;  %v1455_v22 = vmul.f32 0.70710677, %v3351_v8  ;;  %v1423_v25 = vmul.f32 0.5, %v3351_v8 }
 0x2df   : > { %v1574_v34 = vsel %vm1393_vm1, %v1542_v47, %v3258_v14  ;;  %v1545_v16 = vmul.f32 %v1513_v5, %v1417_v63  ;;  %v1511_v61 = vadd.f32 1.0, %v2499_v0 }
 0x2e0   : > { %v2501_v52 = vpop.eup %2500  ;;  %1607 = vst.msk [vmem:[%s3151_s24 + $0xa0] sm:$0xff] %vm1586_vm2, %v1574_v34  ;;  %2514 = verf.f32 %v1455_v22 }
 0x2e1   : > { %v1577_v36 = vsel %vm1393_vm1, %v1545_v16, %v3264_v51  ;;  %v1543_v54 = vmul.f32 %v1511_v61, %v1415_v12  ;;  %v1516_v59 = vadd.f32 1.0, %v2501_v52  ;;  %v1421_v51 = vmul.f32 0.5, %v3303_v24 }
 0x2e2   : > { %v2503_v40 = vpop.eup %2502  ;;  %1610 = vst.msk [vmem:[%s3151_s24 + $0xb8] sm:$0xff] %vm1586_vm2, %v1577_v36 }
 0x2e3   : > { %v2505_v14 = vpop.eup %2504  ;;  %v1575_v31 = vsel %vm1393_vm1, %v1543_v54, %v3278_v30  ;;  %v1548_v21 = vmul.f32 %v1516_v59, %v1420_v56  ;;  %v1514_v50 = vadd.f32 1.0, %v2503_v40 }
 0x2e4   : > { %1608 = vst.msk [vmem:[%s3151_s24 + $0xa8] sm:$0xff] %vm1586_vm2, %v1575_v31  ;;  %v1517_v27 = vadd.f32 1.0, %v2505_v14 }
 0x2e5   : > { %v2507_v48 = vpop.eup %2506  ;;  %v1580_v39 = vsel %vm1393_vm1, %v1548_v21, %v3284_v45  ;;  %v1546_v28 = vmul.f32 %v1514_v50, %v1418_v62 }
 0x2e6   : > { %1613 = vst.msk [vmem:[%s3151_s24 + $0xd0] sm:$0xff] %vm1586_vm2, %v1580_v39  ;;  %v1549_v30 = vmul.f32 %v1517_v27, %v1421_v51  ;;  %v1515_v3 = vadd.f32 1.0, %v2507_v48 }
 0x2e7   : > { %v2509_v6 = vpop.eup %2508  ;;  %v1578_v9 = vsel %vm1393_vm1, %v1546_v28, %v3297_v57 }
 0x2e8   : > { %1611 = vst.msk [vmem:[%s3151_s24 + $0xc0] sm:$0xff] %vm1586_vm2, %v1578_v9  ;;  %v1581_v7 = vsel %vm1393_vm1, %v1549_v30, %v3303_v24  ;;  %v1547_v45 = vmul.f32 %v1515_v3, %v1419_v35  ;;  %v1520_v4 = vadd.f32 1.0, %v2509_v6 }
 0x2e9   : > { %v2511_v11 = vpop.eup %2510  ;;  %1614 = vst.msk [vmem:[%s3151_s24 + $0xd8] sm:$0xff] %vm1586_vm2, %v1581_v7 }
 0x2ea   : > { %v1579_v53 = vsel %vm1393_vm1, %v1547_v45, %v3314_v10  ;;  %v1552_v57 = vmul.f32 %v1520_v4, %v1424_v49  ;;  %v1518_v13 = vadd.f32 1.0, %v2511_v11 }
 0x2eb   : > { %v2513_v42 = vpop.eup %2512  ;;  %1612 = vst.msk [vmem:[%s3151_s24 + $0xc8] sm:$0xff] %vm1586_vm2, %v1579_v53 }
 0x2ec   : > { %v1584_v24 = vsel %vm1393_vm1, %v1552_v57, %v3321_v55  ;;  %v1550_v15 = vmul.f32 %v1518_v13, %v1422_v26  ;;  %v1521_v19 = vadd.f32 1.0, %v2513_v42 }
 0x2ed   : > { %v2515_v37 = vpop.eup %2514  ;;  %1617 = vst.msk [vmem:[%s3151_s24 + $0xf0] sm:$0xff] %vm1586_vm2, %v1584_v24 }
 0x2ee   : > { %v1582_v10 = vsel %vm1393_vm1, %v1550_v15, %v3331_v17  ;;  %v1553_v46 = vmul.f32 %v1521_v19, %v1425_v20  ;;  %v1519_v29 = vadd.f32 1.0, %v2515_v37 }
 0x2ef   : > { %1615 = vst.msk [vmem:[%s3151_s24 + $0xe0] sm:$0xff] %vm1586_vm2, %v1582_v10  ;;  %1625 = sbr.rel (!%p2669_p4) target bundleno = 804 (0x324), region = 52 }
 0x2f0   : > { %v1585_v55 = vsel %vm1393_vm1, %v1553_v46, %v3341_v38  ;;  %v1551_v33 = vmul.f32 %v1519_v29, %v1423_v25 }
 0x2f1   : > { %1618 = vst.msk [vmem:[%s3151_s24 + $0xf8] sm:$0xff] %vm1586_vm2, %v1585_v55 }
 0x2f2   : > { %v1583_v2 = vsel %vm1393_vm1, %v1551_v33, %v3351_v8 }
 0x2f3   : > { %1616 = vst.msk [vmem:[%s3151_s24 + $0xe8] sm:$0xff] %vm1586_vm2, %v1583_v2 }
 0x2f4   : > { %s3581_s30 = smov (!%p1628_p8, %s1627_s30), 32 }
 0x2f5   : > { %s2004_s15 = sshll.u32 %s3581_s30, 7 }
 0x2f6   : > { %p2007_p9 = scmp.eq.s32.totalorder %s2004_s15, 0 }
 0x2f7   : > { %s3437_s16 = sshrl.u32 (!%p2007_p9), %s3581_s30, 5 }
 0x2f8   : > { %1636 = sbr.rel (%p2007_p9) target bundleno = 804 (0x324), region = 56  ;;  %p2008_p10 = scmp.le.s32.totalorder (!%p2007_p9), %s3437_s16, 0 }
 0x2fd   : > { %1915 = sbr.rel (%p2008_p10) target bundleno = 787 (0x313), region = 132  ;;  %s3572_s27 = smov (!%p2008_p10), %s3431_s14 }
 0x2fe   : > { %s3573_s9 = smov (!%p2008_p10), %s3151_s24  ;;  %s3446_s12 = smov (!%p2008_p10), 0  }
 0x2ff   : > { %s3448_s17 = smov (!%p2008_p10), 0  }
 0x302 LB: >> { %v1761_v1 = vld [vmem:[%s2578_s9] sm:$0xff]  ;;  %v1763_v17 = vld [vmem:[%s2578_s9 + $0x8] sm:$0xff]  ;;  %v1765_v38 = vld [vmem:[%s2578_s9 + $0x10] sm:$0xff]  ;;  %s1825_s18 = sadd.s32 1, %s2582_s12  ;;  %s1755_s17 = sadd.s32 1, %s2586_s17   ;;  %s2586_s17 = sphi %s3448_s17, %s1755_s17   ;;  %s2582_s12 = sphi %s3446_s12, %s3576_s12   ;;  %s2578_s9 = sphi %s3573_s9, %s3575_s9   ;;  %s2574_s27 = sphi %s3572_s27, %s3574_s27  }
 0x303   : >> { %1762 = vst [vmem:[%s2574_s27] sm:$0xff] %v1761_v1  ;;  %1764 = vst [vmem:[%s2574_s27 + $0x8] sm:$0xff] %v1763_v17  ;;  %v1767_v58 = vld [vmem:[%s2578_s9 + $0x18] sm:$0xff]  ;;  %v1769_v23 = vld [vmem:[%s2578_s9 + $0x20] sm:$0xff]  ;;  %p1826_p11 = scmp.ge.s32.totalorder %s1825_s18, %s3437_s16  ;;  %p1754_p12 = scmp.ge.s32.totalorder %s1755_s17, %s3437_s16 }
 0x304   : >> { %1766 = vst [vmem:[%s2574_s27 + $0x10] sm:$0xff] %v1765_v38  ;;  %v1771_v44 = vld [vmem:[%s2578_s9 + $0x28] sm:$0xff]  ;;  %1768 = vst [vmem:[%s2574_s27 + $0x18] sm:$0xff] %v1767_v58  ;;  %v1773_v41 = vld [vmem:[%s2578_s9 + $0x30] sm:$0xff] }
 0x305   : >> { %1770 = vst [vmem:[%s2574_s27 + $0x20] sm:$0xff] %v1769_v23  ;;  %1772 = vst [vmem:[%s2574_s27 + $0x28] sm:$0xff] %v1771_v44  ;;  %v1775_v32 = vld [vmem:[%s2578_s9 + $0x38] sm:$0xff]  ;;  %v1777_v43 = vld [vmem:[%s2578_s9 + $0x40] sm:$0xff]  ;;  %s3583_s18 = smov (%p1826_p11, %s1825_s18), 0 }
 0x306   : >> { %1774 = vst [vmem:[%s2574_s27 + $0x30] sm:$0xff] %v1773_v41  ;;  %1776 = vst [vmem:[%s2574_s27 + $0x38] sm:$0xff] %v1775_v32  ;;  %v1779_v18 = vld [vmem:[%s2578_s9 + $0x48] sm:$0xff]  ;;  %v1781_v8 = vld [vmem:[%s2578_s9 + $0x50] sm:$0xff]  ;;  %s2009_s19 = sshll.u32 %s3583_s18, 8  ;;  %s3576_s12 = smov %s3583_s18 }
 0x307   : >> { %1778 = vst [vmem:[%s2574_s27 + $0x40] sm:$0xff] %v1777_v43  ;;  %v1783_v60 = vld [vmem:[%s2578_s9 + $0x58] sm:$0xff]  ;;  %1780 = vst [vmem:[%s2574_s27 + $0x48] sm:$0xff] %v1779_v18  ;;  %v1785_v47 = vld [vmem:[%s2578_s9 + $0x60] sm:$0xff]  ;;  %s3504_s20 = scalar_lea.vmem %s3151_s24, %s2009_s19 [#allocation2]   ;;  %s1831_s21 = scalar_lea.vmem %s3431_s14, %s2009_s19  }
 0x308   : >> { %1782 = vst [vmem:[%s2574_s27 + $0x50] sm:$0xff] %v1781_v8  ;;  %1784 = vst [vmem:[%s2574_s27 + $0x58] sm:$0xff] %v1783_v60  ;;  %v1787_v63 = vld [vmem:[%s2578_s9 + $0x68] sm:$0xff]  ;;  %v1789_v5 = vld [vmem:[%s2578_s9 + $0x70] sm:$0xff] }
 0x309   : >> { %1786 = vst [vmem:[%s2574_s27 + $0x60] sm:$0xff] %v1785_v47  ;;  %1788 = vst [vmem:[%s2574_s27 + $0x68] sm:$0xff] %v1787_v63  ;;  %v1791_v0 = vld [vmem:[%s2578_s9 + $0x78] sm:$0xff]  ;;  %v1793_v22 = vld [vmem:[%s2578_s9 + $0x80] sm:$0xff] }
 0x30a   : >> { %1790 = vst [vmem:[%s2574_s27 + $0x70] sm:$0xff] %v1789_v5  ;;  %v1795_v34 = vld [vmem:[%s2578_s9 + $0x88] sm:$0xff]  ;;  %1792 = vst [vmem:[%s2574_s27 + $0x78] sm:$0xff] %v1791_v0  ;;  %v1797_v16 = vld [vmem:[%s2578_s9 + $0x90] sm:$0xff] }
 0x30b   : >> { %1794 = vst [vmem:[%s2574_s27 + $0x80] sm:$0xff] %v1793_v22  ;;  %1796 = vst [vmem:[%s2574_s27 + $0x88] sm:$0xff] %v1795_v34  ;;  %v1799_v12 = vld [vmem:[%s2578_s9 + $0x98] sm:$0xff]  ;;  %v1801_v61 = vld [vmem:[%s2578_s9 + $0xa0] sm:$0xff] }
 0x30c   : >> { %1798 = vst [vmem:[%s2574_s27 + $0x90] sm:$0xff] %v1797_v16  ;;  %1800 = vst [vmem:[%s2574_s27 + $0x98] sm:$0xff] %v1799_v12  ;;  %v1803_v52 = vld [vmem:[%s2578_s9 + $0xa8] sm:$0xff]  ;;  %v1805_v36 = vld [vmem:[%s2578_s9 + $0xb0] sm:$0xff] }
 0x30d   : >> { %1802 = vst [vmem:[%s2574_s27 + $0xa0] sm:$0xff] %v1801_v61  ;;  %v1807_v54 = vld [vmem:[%s2578_s9 + $0xb8] sm:$0xff]  ;;  %1804 = vst [vmem:[%s2574_s27 + $0xa8] sm:$0xff] %v1803_v52  ;;  %v1809_v56 = vld [vmem:[%s2578_s9 + $0xc0] sm:$0xff] }
 0x30e   : >> { %1806 = vst [vmem:[%s2574_s27 + $0xb0] sm:$0xff] %v1805_v36  ;;  %1808 = vst [vmem:[%s2574_s27 + $0xb8] sm:$0xff] %v1807_v54  ;;  %v1811_v59 = vld [vmem:[%s2578_s9 + $0xc8] sm:$0xff]  ;;  %v1813_v40 = vld [vmem:[%s2578_s9 + $0xd0] sm:$0xff]  ;;  %1757 = sbr.rel (!%p1754_p12) target bundleno = 770 (0x302), region = 138 }
 0x30f   : >> { %1810 = vst [vmem:[%s2574_s27 + $0xc0] sm:$0xff] %v1809_v56  ;;  %1812 = vst [vmem:[%s2574_s27 + $0xc8] sm:$0xff] %v1811_v59  ;;  %v1815_v14 = vld [vmem:[%s2578_s9 + $0xd8] sm:$0xff]  ;;  %v1817_v31 = vld [vmem:[%s2578_s9 + $0xe0] sm:$0xff] }
 0x310   : >> { %1814 = vst [vmem:[%s2574_s27 + $0xd0] sm:$0xff] %v1813_v40  ;;  %v1819_v21 = vld [vmem:[%s2578_s9 + $0xe8] sm:$0xff]  ;;  %1816 = vst [vmem:[%s2574_s27 + $0xd8] sm:$0xff] %v1815_v14  ;;  %v1821_v62 = vld [vmem:[%s2578_s9 + $0xf0] sm:$0xff] }
 0x311   : >> { %1818 = vst [vmem:[%s2574_s27 + $0xe0] sm:$0xff] %v1817_v31  ;;  %1820 = vst [vmem:[%s2574_s27 + $0xe8] sm:$0xff] %v1819_v21  ;;  %v1823_v50 = vld [vmem:[%s2578_s9 + $0xf8] sm:$0xff]  ;;  %s3575_s9 = smov %s3504_s20 }
 0x312   : >> { %1822 = vst [vmem:[%s2574_s27 + $0xf0] sm:$0xff] %v1821_v62  ;;  %1824 = vst [vmem:[%s2574_s27 + $0xf8] sm:$0xff] %v1823_v50  ;;  %s3574_s27 = smov %s1831_s21 }
 0x313 PF: > { %s3545_s22 = sand.u32 31, %s3581_s30   ;;  %s2020_s23 = sshll.u32 %s3437_s16, 8 }
 0x314   : > { %s1836_s26 = scalar_lea.vmem %s3151_s24, %s2020_s23 [#allocation2]   ;;  %s1838_s29 = scalar_lea.vmem %s3431_s14, %s2020_s23  }
 0x315   : > { %p2014_p13 = scmp.le.s32.totalorder %s3545_s22, 0 }
 0x316   : > { %s2588_s10 = smov (!%p2014_p13), %s1838_s29   ;;  %s2592_s11 = smov (!%p2014_p13), %s1836_s26  }
 0x317   : > { %1929 = sbr.rel (%p2014_p13) target bundleno = 804 (0x324), region = 143  ;;  %s2596_s13 = smov (!%p2014_p13), 0  }
 0x318   : > { %s2600_s15 = smov (!%p2014_p13), 0  }
 0x31c LB: >> { %v1848_v51 = vld [vmem:[%s2594_s11] sm:$0xff]  ;;  %s1850_s30 = sadd.s32 1, %s2598_s13  ;;  %s1842_s15 = sadd.s32 1, %s2602_s15   ;;  %s2602_s15 = sphi %s2600_s15, %s1842_s15   ;;  %s2598_s13 = sphi %s2596_s13, %s2597_s13   ;;  %s2594_s11 = sphi %s2592_s11, %s1855_s11   ;;  %s2590_s10 = sphi %s2588_s10, %s1856_s10  }
 0x31d   : >> { %1849 = vst [vmem:[%s2590_s10] sm:$0xff] %v1848_v51  ;;  %p1851_p0 = scmp.ge.s32.totalorder %s1850_s30, %s3545_s22  ;;  %p1841_p1 = scmp.ge.s32.totalorder %s1842_s15, %s3545_s22 }
 0x31f   : >> { %s3585_s30 = smov (%p1851_p0, %s1850_s30), 0  ;;  %1844 = sbr.rel (!%p1841_p1) target bundleno = 796 (0x31c), region = 149 }
 0x320   : >> { %s2015_s24 = sshll.u32 %s3585_s30, 3  ;;  %s2597_s13 = smov %s3585_s30  }
 0x321   : >> { %s1855_s11 = scalar_lea.vmem %s1836_s26, %s2015_s24 [#allocation2]   ;;  %s1856_s10 = scalar_lea.vmem %s1838_s29, %s2015_s24  }
 0x324 PF: > { %p14_p2 = scmp.ge.s32.totalorder %s2659_s28, 6   ;;  %s3577_s24 = smov %s2566_s25 }
 0x325   : > { %s3578_s25 = smov %s2667_s8  ;;  %s3579_s26 = smov %s2659_s28 }
 0x326   :  { %16 = sbr.rel (!%p14_p2) target bundleno = 2 (0x2), region = 160 }

</bundles_post_ra>
